<compile_context>
chip_gen: v5e
topology: v5e:2x2
jax: 0.10.0
libtpu: 0.0.40
codegen_flags: <defaults>
</compile_context>

<pallas_src>
import math
from functools import partial

import jax
import jax.numpy as jnp
import numpy as np
from jax import lax
from jax.experimental import pallas as pl
from jax.experimental.pallas import tpu as pltpu

LN_EPS = 1e-5
_SQRT_2_OVER_PI = 0.7978845608028654


def _gelu(x, exact):
    if exact:
        return 0.5 * x * (1.0 + lax.erf(x * (1.0 / math.sqrt(2.0))))
    # tanh approximation routes through the EUP (separate VLIW slot) instead
    # of a long erf polynomial on the VPU -- matters most on v5e.
    return 0.5 * x * (1.0 + jnp.tanh(_SQRT_2_OVER_PI *
                                     (x + 0.044715 * x * x * x)))


def _mtransformer_kernel(x_ref, g1_ref, be1_ref, wqkv_ref, wo_ref, bo_ref,
                         g2_ref, be2_ref, w1_ref, b1_ref, w2_ref, b2_ref,
                         o_ref, oc_ref, *, heads, dim_head, n_true,
                         exact_gelu):
    layer = pl.program_id(1)

    # Depth is the inner ("arbitrary") grid axis and the output block index is
    # constant across it, so o_ref is the VMEM-resident activation accumulator
    # for the whole layer stack.  Initialize it from x on layer 0.
    @pl.when(layer == 0)
    def _():
        o_ref[...] = x_ref[...]

    G, N, D = o_ref.shape
    inner = heads * dim_head
    scale = dim_head ** -0.5
    bf16 = jnp.bfloat16

    x = o_ref[...].reshape(G * N, D)                    # f32 residual stream

    # ---------------- PreNorm + MAttention ----------------
    mu = jnp.mean(x, axis=-1, keepdims=True)
    var = jnp.mean(jnp.square(x - mu), axis=-1, keepdims=True)
    xn = (x - mu) * lax.rsqrt(var + LN_EPS)
    xn = xn * g1_ref[0] + be1_ref[0]

    # One lane-wide QKV GEMM over all G*N rows (bf16 operands, f32 acc).
    # Keep the result bf16: it is only ever consumed as a bf16 MXU operand.
    qkv = jnp.dot(xn.astype(bf16), wqkv_ref[0],
                  preferred_element_type=jnp.float32).astype(bf16)  # (G*N, 3*inner)

    if n_true < N:
        # Padded sequence positions must not participate as attention keys.
        key_mask = lax.broadcasted_iota(jnp.int32, (1, 1, N), 2) < n_true
    else:
        key_mask = None

    # TODO(synk): fold heads into the einsum batch dim ((G*heads, N, d_h)
    # operands) once the required middle-dim transpose relayout is verified on
    # all generations; the loop below keeps G-batched matmuls per head.
    for h in range(heads):                              # static, small
        q = qkv[:, h * dim_head:(h + 1) * dim_head].reshape(G, N, dim_head)
        k = qkv[:, inner + h * dim_head:
                inner + (h + 1) * dim_head].reshape(G, N, dim_head)
        v = qkv[:, 2 * inner + h * dim_head:
                2 * inner + (h + 1) * dim_head].reshape(G, N, dim_head)

        dots = jnp.einsum('gnd,gmd->gnm', q, k,
                          preferred_element_type=jnp.float32) * scale  # (G,N,N)
        if key_mask is not None:
            dots = jnp.where(key_mask, dots, -1e30)
        dots = dots - jnp.max(dots, axis=-1, keepdims=True)
        p = jnp.exp(dots)
        # softmax denominator via EUP approximate reciprocal (off the VPU)
        p = p * pl.reciprocal(jnp.sum(p, axis=-1, keepdims=True), approx=True)

        o_h = jnp.einsum('gnm,gmd->gnd', p.astype(bf16), v,
                         preferred_element_type=jnp.float32)            # (G,N,d_h)
        # Stage the per-head output into the head-concat scratch (bf16).
        oc_ref[:, h * dim_head:(h + 1) * dim_head] = (
            o_h.reshape(G * N, dim_head).astype(bf16))

    # Single output projection with K = inner (full MXU contraction depth)
    # instead of `heads` K=dim_head matmuls.
    attn = jnp.dot(oc_ref[...], wo_ref[0], preferred_element_type=jnp.float32)

    x = x + attn + bo_ref[0]                            # residual (+ wo bias)

    # ---------------- PreNorm + FeedForward (hidden dim tiled) ----------------
    mu2 = jnp.mean(x, axis=-1, keepdims=True)
    var2 = jnp.mean(jnp.square(x - mu2), axis=-1, keepdims=True)
    xn2 = (x - mu2) * lax.rsqrt(var2 + LN_EPS)
    xn2 = (xn2 * g2_ref[0] + be2_ref[0]).astype(bf16)

    n_chunks = w1_ref.shape[1]        # w1 block: (1, n_chunks, D, chunk)

    # TODO(synk): additionally row-chunk the whole layer body (LN/QKV/softmax/
    # MLP are row-wise) to bound every (G*N, .) intermediate at ViT-B scale.
    def ff_chunk(c, acc):
        w1c = w1_ref[0, c]            # (D, chunk)   bf16
        b1c = b1_ref[0, c]            # (1, chunk)   f32
        w2c = w2_ref[0, c]            # (chunk, D)   bf16
        h1 = jnp.dot(xn2, w1c, preferred_element_type=jnp.float32) + b1c
        h1 = _gelu(h1, exact_gelu)
        return acc + jnp.dot(h1.astype(bf16), w2c,
                             preferred_element_type=jnp.float32)

    h2 = lax.fori_loop(0, n_chunks, ff_chunk,
                       jnp.zeros((G * N, D), jnp.float32))

    o_ref[...] = (x + h2 + b2_ref[0]).reshape(G, N, D)  # stays resident in VMEM


def _device_kind():
    try:
        return jax.devices()[0].device_kind.lower()
    except Exception:
        return ""


def _default_vmem_limit_bytes(kind):
    # v5e/v6e: 128 MiB physical VMEM per TensorCore -> use most of it.
    # v7x: only 64 MiB physical -> request well under it so Mosaic keeps
    # headroom for internal scratch; unknown chips get the conservative value.
    if ("v5" in kind) or ("v6" in kind):
        return 100 * 1024 * 1024
    return 48 * 1024 * 1024


def _default_block_bp(kind):
    # Larger slab tiles amortize the per-layer weight re-streaming (slab axis
    # outer, depth inner) and per-grid-step overhead; most important on v5e.
    if ("v5" in kind) or ("v6" in kind):
        return 16
    return 8


def mtransformer_forward(x, params, heads, dim_head, *, block_bp=None,
                         mlp_chunk=512, exact_gelu=False,
                         vmem_limit_bytes=None):
    """x: (b, p, n, dim) f32; params: list of per-layer f32 param tuples."""
    b, p, n, d = x.shape
    bp = b * p
    depth = len(params)

    kind = _device_kind()
    if block_bp is None:
        block_bp = _default_block_bp(kind)
    if vmem_limit_bytes is None:
        vmem_limit_bytes = _default_vmem_limit_bytes(kind)

    xf = x.reshape(bp, n, d)

    # Pad the sequence axis to a sublane multiple (padded keys are masked in
    # the kernel's softmax; padded query rows are sliced off below).
    n_pad = ((n + 7) // 8) * 8
    if n_pad != n:
        xf = jnp.pad(xf, ((0, 0), (0, n_pad - n), (0, 0)))

    # Pad the slab axis so block_bp divides it (padded slabs compute harmless
    # garbage and are sliced off at the end).
    block_bp = max(1, min(block_bp, bp))
    bp_pad = ((bp + block_bp - 1) // block_bp) * block_bp
    if bp_pad != bp:
        xf = jnp.concatenate(
            [xf, jnp.zeros((bp_pad - bp, n_pad, d), xf.dtype)], axis=0)

    inner = heads * dim_head
    mlp_dim = params[0][7].shape[1]
    mlp_chunk = max(1, min(mlp_chunk, mlp_dim))
    n_chunks = -(-mlp_dim // mlp_chunk)
    mlp_pad = n_chunks * mlp_chunk

    def stack(i, dtype=jnp.float32):
        return jnp.stack([lp[i] for lp in params], axis=0).astype(dtype)

    # MLP weights: chunk the hidden dim along a new leading axis so the kernel
    # iterates hidden-chunks with cheap leading-axis dynamic indexing, bounding
    # the f32 h1 intermediate (padding columns/rows contribute exactly zero).
    w1 = stack(7, jnp.bfloat16)                      # (depth, D, mlp)
    b1 = stack(8)                                    # (depth, 1, mlp)
    w2 = stack(9, jnp.bfloat16)                      # (depth, mlp, D)
    if mlp_pad != mlp_dim:
        w1 = jnp.pad(w1, ((0, 0), (0, 0), (0, mlp_pad - mlp_dim)))
        b1 = jnp.pad(b1, ((0, 0), (0, 0), (0, mlp_pad - mlp_dim)))
        w2 = jnp.pad(w2, ((0, 0), (0, mlp_pad - mlp_dim), (0, 0)))
    w1 = w1.reshape(depth, d, n_chunks, mlp_chunk).transpose(0, 2, 1, 3)
    b1 = b1.reshape(depth, 1, n_chunks, mlp_chunk).transpose(0, 2, 1, 3)
    w2 = w2.reshape(depth, n_chunks, mlp_chunk, d)

    stacked = (
        stack(0), stack(1),                  # g1, be1   (depth, 1, D)
        stack(2, jnp.bfloat16),              # wqkv      (depth, D, 3*inner)
        stack(3, jnp.bfloat16),              # wo        (depth, inner, D)
        stack(4),                            # bo        (depth, 1, D)
        stack(5), stack(6),                  # g2, be2   (depth, 1, D)
        w1,                                  # (depth, n_chunks, D, chunk)  bf16
        b1,                                  # (depth, n_chunks, 1, chunk)  f32
        w2,                                  # (depth, n_chunks, chunk, D)  bf16
        stack(10),                           # b2        (depth, 1, D)
    )

    grid = (bp_pad // block_bp, depth)
    kernel = partial(_mtransformer_kernel, heads=heads, dim_head=dim_head,
                     n_true=n, exact_gelu=exact_gelu)

    # Per-layer parameter blocks: indexed by the depth grid axis only.
    param_specs = [
        pl.BlockSpec((1,) + tuple(a.shape[1:]),
                     lambda i, l, _nd=a.ndim: (l,) + (0,) * (_nd - 1))
        for a in stacked
    ]

    # TODO(synk): on v7x, mark the x input single-buffered
    # (pipeline_mode=pl.Buffered(1)) once verified on the target runtime --
    # it is only read at layer==0, so its second pipeline buffer is dead VMEM
    # for depth-1 of every depth sweep.
    yf = pl.pallas_call(
        kernel,
        out_shape=jax.ShapeDtypeStruct((bp_pad, n_pad, d), xf.dtype),
        grid=grid,
        in_specs=[pl.BlockSpec((block_bp, n_pad, d), lambda i, l: (i, 0, 0))]
                 + param_specs,
        out_specs=pl.BlockSpec((block_bp, n_pad, d), lambda i, l: (i, 0, 0)),
        scratch_shapes=[pltpu.VMEM((block_bp * n_pad, inner), jnp.bfloat16)],
        compiler_params=pltpu.CompilerParams(
            dimension_semantics=("parallel", "arbitrary"),
            vmem_limit_bytes=vmem_limit_bytes,
        ),
    )(xf, *stacked)

    return yf[:bp, :n].reshape(b, p, n, d)


# ---------------- pure-JAX reference (same bf16 matmul precision) ----------------
def _ref_forward(x, params, heads, dim_head):
    inner = heads * dim_head
    scale = dim_head ** -0.5
    bf16 = jnp.bfloat16

    def ln(t, g, be):
        mu = jnp.mean(t, -1, keepdims=True)
        var = jnp.mean((t - mu) ** 2, -1, keepdims=True)
        return (t - mu) / jnp.sqrt(var + LN_EPS) * g[0] + be[0]

    def mm(a, w):
        return jnp.dot(a.astype(bf16), w.astype(bf16),
                       preferred_element_type=jnp.float32)

    for (g1, be1, wqkv, wo, bo, g2, be2, w1, b1, w2, b2) in params:
        xn = ln(x, g1, be1)
        qkv = mm(xn, wqkv)
        b_, p_, n_, _ = qkv.shape
        q, k, v = jnp.split(qkv, 3, axis=-1)
        resh = lambda t: t.reshape(b_, p_, n_, heads, dim_head).transpose(0, 1, 3, 2, 4)
        q, k, v = resh(q), resh(k), resh(v)
        dots = jnp.einsum("bphnd,bphmd->bphnm", q.astype(bf16), k.astype(bf16),
                          preferred_element_type=jnp.float32) * scale
        attn = jax.nn.softmax(dots, axis=-1)
        out = jnp.einsum("bphnm,bphmd->bphnd", attn.astype(bf16), v.astype(bf16),
                         preferred_element_type=jnp.float32)
        out = out.transpose(0, 1, 3, 2, 4).reshape(b_, p_, n_, inner)
        x = mm(out, wo) + bo[0] + x
        xn2 = ln(x, g2, be2)
        h1 = mm(xn2, w1) + b1[0]
        h1 = 0.5 * h1 * (1.0 + jax.scipy.special.erf(h1 / math.sqrt(2.0)))
        x = mm(h1, w2) + b2[0] + x
    return x


# ---------------- deterministic parameter construction ----------------
def init_params(key, depth, dim, heads, dim_head, mlp_dim):
    inner = heads * dim_head
    params = []
    for _ in range(depth):
        keys = jax.random.split(key, 8)
        key = keys[0]
        g1 = 1.0 + 0.02 * jax.random.normal(keys[1], (1, dim), jnp.float32)
        be1 = 0.02 * jax.random.normal(keys[2], (1, dim), jnp.float32)
        wqkv = 0.05 * jax.random.normal(keys[3], (dim, 3 * inner), jnp.float32)
        wo = 0.05 * jax.random.normal(keys[4], (inner, dim), jnp.float32)
        bo = 0.02 * jax.random.normal(keys[5], (1, dim), jnp.float32)
        g2 = 1.0 + 0.02 * jax.random.normal(keys[6], (1, dim), jnp.float32)
        be2 = 0.02 * jax.random.normal(keys[7], (1, dim), jnp.float32)
        keys2 = jax.random.split(key, 6)
        key = keys2[0]
        w1 = 0.05 * jax.random.normal(keys2[1], (dim, mlp_dim), jnp.float32)
        b1 = 0.02 * jax.random.normal(keys2[2], (1, mlp_dim), jnp.float32)
        w2 = 0.05 * jax.random.normal(keys2[3], (mlp_dim, dim), jnp.float32)
        b2 = 0.02 * jax.random.normal(keys2[4], (1, dim), jnp.float32)
        params.append((g1, be1, wqkv, wo, bo, g2, be2, w1, b1, w2, b2))
    return params


if __name__ == "__main__":
    # Small shapes consistent with MTransformer's 'b p n d' input.
    B, P, N, DIM = 2, 2, 8, 32
    HEADS, DIM_HEAD, MLP_DIM, DEPTH = 2, 16, 64, 2

    key = jax.random.PRNGKey(0)
    kx, kp = jax.random.split(key)
    x = jax.random.normal(kx, (B, P, N, DIM), jnp.float32)
    params = init_params(kp, DEPTH, DIM, HEADS, DIM_HEAD, MLP_DIM)

    # block_bp=2 -> 2 slab tiles on the "parallel" grid axis.
    y = mtransformer_forward(x, params, HEADS, DIM_HEAD, block_bp=2)
    y = jax.block_until_ready(y)

    y_ref = jax.block_until_ready(_ref_forward(x, params, HEADS, DIM_HEAD))
    np.testing.assert_allclose(np.asarray(y), np.asarray(y_ref),
                               rtol=2e-2, atol=2e-2)

    print("KERNEL_OK")
</pallas_src>

<mosaic_0001>
module attributes {stable_mosaic.version = 11 : i64} {
  func.func @_mtransformer_kernel(%arg0: i32, %arg1: i32, %arg2: memref<2x8x32xf32, #tpu.memory_space<vmem>>, %arg3: memref<1x1x32xf32, #tpu.memory_space<vmem>>, %arg4: memref<1x1x32xf32, #tpu.memory_space<vmem>>, %arg5: memref<1x32x96xbf16, #tpu.memory_space<vmem>>, %arg6: memref<1x32x32xbf16, #tpu.memory_space<vmem>>, %arg7: memref<1x1x32xf32, #tpu.memory_space<vmem>>, %arg8: memref<1x1x32xf32, #tpu.memory_space<vmem>>, %arg9: memref<1x1x32xf32, #tpu.memory_space<vmem>>, %arg10: memref<1x1x32x64xbf16, #tpu.memory_space<vmem>>, %arg11: memref<1x1x1x64xf32, #tpu.memory_space<vmem>>, %arg12: memref<1x1x64x32xbf16, #tpu.memory_space<vmem>>, %arg13: memref<1x1x32xf32, #tpu.memory_space<vmem>>, %arg14: memref<2x8x32xf32, #tpu.memory_space<vmem>>, %arg15: memref<16x32xbf16, #tpu.memory_space<vmem>>) attributes {dimension_semantics = [#tpu.dimension_semantics<parallel>, #tpu.dimension_semantics<arbitrary>], iteration_bounds = array<i64: 2, 2>, scalar_prefetch = 0 : i64, scratch_operands = 1 : i64, tpu.core_type = #tpu.core_type<tc>, window_params = [{transform_indices = @transform_0, window_bounds = array<i64: 2, 8, 32>}, {transform_indices = @transform_1, window_bounds = array<i64: 1, 1, 32>}, {transform_indices = @transform_2, window_bounds = array<i64: 1, 1, 32>}, {transform_indices = @transform_3, window_bounds = array<i64: 1, 32, 96>}, {transform_indices = @transform_4, window_bounds = array<i64: 1, 32, 32>}, {transform_indices = @transform_5, window_bounds = array<i64: 1, 1, 32>}, {transform_indices = @transform_6, window_bounds = array<i64: 1, 1, 32>}, {transform_indices = @transform_7, window_bounds = array<i64: 1, 1, 32>}, {transform_indices = @transform_8, window_bounds = array<i64: 1, 1, 32, 64>}, {transform_indices = @transform_9, window_bounds = array<i64: 1, 1, 1, 64>}, {transform_indices = @transform_10, window_bounds = array<i64: 1, 1, 64, 32>}, {transform_indices = @transform_11, window_bounds = array<i64: 1, 1, 32>}, {transform_indices = @transform_12, window_bounds = array<i64: 2, 8, 32>}]} {
    %c0_i32 = arith.constant 0 : i32
    %0 = arith.cmpi eq, %arg1, %c0_i32 : i32
    %1 = arith.extui %0 : i1 to i32
    %c0_i32_0 = arith.constant 0 : i32
    %2 = arith.cmpi ne, %1, %c0_i32_0 : i32
    scf.if %2 {
      %c0_73 = arith.constant 0 : index
      %c0_74 = arith.constant 0 : index
      %c0_75 = arith.constant 0 : index
      %156 = vector.load %arg2[%c0_73, %c0_74, %c0_75] : memref<2x8x32xf32, #tpu.memory_space<vmem>>, vector<2x8x32xf32>
      %c0_76 = arith.constant 0 : index
      %c0_77 = arith.constant 0 : index
      %c0_78 = arith.constant 0 : index
      %157 = vector.load %arg14[%c0_76, %c0_77, %c0_78] : memref<2x8x32xf32, #tpu.memory_space<vmem>>, vector<2x8x32xf32>
      tpu.vector_store %arg14[%c0_76, %c0_77, %c0_78], %156 {strides = array<i32>} : memref<2x8x32xf32, #tpu.memory_space<vmem>>, vector<2x8x32xf32>,
    } else {
    }
    %c0 = arith.constant 0 : index
    %c0_1 = arith.constant 0 : index
    %c0_2 = arith.constant 0 : index
    %3 = vector.load %arg14[%c0, %c0_1, %c0_2] : memref<2x8x32xf32, #tpu.memory_space<vmem>>, vector<2x8x32xf32>
    %4 = vector.shape_cast %3 : vector<2x8x32xf32> to vector<16x32xf32>
    %cst = arith.constant dense<0.000000e+00> : vector<16xf32>
    %5 = vector.multi_reduction <add>, %4, %cst [1] : vector<16x32xf32> to vector<16xf32>
    %6 = vector.shape_cast %5 : vector<16xf32> to vector<16x1xf32>
    %cst_3 = arith.constant 3.200000e+01 : f32
    %7 = vector.broadcast %cst_3 : f32 to vector<16x1xf32>
    %8 = arith.divf %6, %7 : vector<16x1xf32>
    %9 = vector.broadcast %8 : vector<16x1xf32> to vector<16x32xf32>
    %10 = arith.subf %4, %9 : vector<16x32xf32>
    %11 = arith.mulf %10, %10 : vector<16x32xf32>
    %cst_4 = arith.constant dense<0.000000e+00> : vector<16xf32>
    %12 = vector.multi_reduction <add>, %11, %cst_4 [1] : vector<16x32xf32> to vector<16xf32>
    %13 = vector.shape_cast %12 : vector<16xf32> to vector<16x1xf32>
    %cst_5 = arith.constant 3.200000e+01 : f32
    %14 = vector.broadcast %cst_5 : f32 to vector<16x1xf32>
    %15 = arith.divf %13, %14 : vector<16x1xf32>
    %16 = vector.broadcast %8 : vector<16x1xf32> to vector<16x32xf32>
    %17 = arith.subf %4, %16 : vector<16x32xf32>
    %cst_6 = arith.constant 9.99999974E-6 : f32
    %18 = vector.broadcast %cst_6 : f32 to vector<16x1xf32>
    %19 = arith.addf %15, %18 : vector<16x1xf32>
    %20 = math.rsqrt %19 : vector<16x1xf32>
    %21 = vector.broadcast %20 : vector<16x1xf32> to vector<16x32xf32>
    %22 = arith.mulf %17, %21 : vector<16x32xf32>
    %c0_7 = arith.constant 0 : index
    %c0_8 = arith.constant 0 : index
    %c0_9 = arith.constant 0 : index
    %23 = vector.load %arg3[%c0_7, %c0_8, %c0_9] : memref<1x1x32xf32, #tpu.memory_space<vmem>>, vector<1x1x32xf32>
    %24 = vector.shape_cast %23 : vector<1x1x32xf32> to vector<1x32xf32>
    %25 = vector.broadcast %24 : vector<1x32xf32> to vector<16x32xf32>
    %26 = arith.mulf %22, %25 : vector<16x32xf32>
    %c0_10 = arith.constant 0 : index
    %c0_11 = arith.constant 0 : index
    %c0_12 = arith.constant 0 : index
    %27 = vector.load %arg4[%c0_10, %c0_11, %c0_12] : memref<1x1x32xf32, #tpu.memory_space<vmem>>, vector<1x1x32xf32>
    %28 = vector.shape_cast %27 : vector<1x1x32xf32> to vector<1x32xf32>
    %29 = vector.broadcast %28 : vector<1x32xf32> to vector<16x32xf32>
    %30 = arith.addf %26, %29 : vector<16x32xf32>
    %31 = arith.truncf %30 : vector<16x32xf32> to vector<16x32xbf16>
    %c0_13 = arith.constant 0 : index
    %c0_14 = arith.constant 0 : index
    %c0_15 = arith.constant 0 : index
    %32 = vector.load %arg5[%c0_13, %c0_14, %c0_15] : memref<1x32x96xbf16, #tpu.memory_space<vmem>>, vector<1x32x96xbf16>
    %33 = vector.shape_cast %32 : vector<1x32x96xbf16> to vector<32x96xbf16>
    %cst_16 = arith.constant dense<0.000000e+00> : vector<16x96xf32>
    %34 = tpu.matmul %31, %33, %cst_16 {dimension_numbers = #tpu.dot_dimension_numbers<[1], [0], [0], [1], [0, 0, 1, 1], [], []>} : vector<16x32xbf16>, vector<32x96xbf16>, vector<16x96xf32> -> vector<16x96xf32>
    %35 = arith.truncf %34 : vector<16x96xf32> to vector<16x96xbf16>
    %36 = vector.extract_strided_slice %35 {offsets = [0, 0], sizes = [16, 16], strides = [1, 1]} : vector<16x96xbf16> to vector<16x16xbf16>
    %37 = vector.shape_cast %36 : vector<16x16xbf16> to vector<2x8x16xbf16>
    %38 = vector.extract_strided_slice %35 {offsets = [0, 32], sizes = [16, 16], strides = [1, 1]} : vector<16x96xbf16> to vector<16x16xbf16>
    %39 = vector.shape_cast %38 : vector<16x16xbf16> to vector<2x8x16xbf16>
    %40 = vector.extract_strided_slice %35 {offsets = [0, 64], sizes = [16, 16], strides = [1, 1]} : vector<16x96xbf16> to vector<16x16xbf16>
    %41 = vector.shape_cast %40 : vector<16x16xbf16> to vector<2x8x16xbf16>
    "tpu.trace_start"() <{level = 10 : i32, message = "gnd,gmd->gnm"}> : () -> ()
    %cst_17 = arith.constant dense<0.000000e+00> : vector<2x8x8xf32>
    %42 = tpu.matmul %37, %39, %cst_17 {dimension_numbers = #tpu.dot_dimension_numbers<[2], [2], [1], [1], [0, 0, 0, 1, 1, 1], [0], [0]>} : vector<2x8x16xbf16>, vector<2x8x16xbf16>, vector<2x8x8xf32> -> vector<2x8x8xf32>
    "tpu.trace_stop"() : () -> ()
    %cst_18 = arith.constant 2.500000e-01 : f32
    %43 = vector.broadcast %cst_18 : f32 to vector<2x8x8xf32>
    %44 = arith.mulf %42, %43 : vector<2x8x8xf32>
    %cst_19 = arith.constant dense<0xFF800000> : vector<2x8xf32>
    %45 = vector.multi_reduction <maximumf>, %44, %cst_19 [2] : vector<2x8x8xf32> to vector<2x8xf32>
    %46 = vector.shape_cast %45 : vector<2x8xf32> to vector<2x8x1xf32>
    %47 = vector.broadcast %46 : vector<2x8x1xf32> to vector<2x8x8xf32>
    %48 = arith.subf %44, %47 : vector<2x8x8xf32>
    %49 = math.exp %48 : vector<2x8x8xf32>
    %cst_20 = arith.constant dense<0.000000e+00> : vector<2x8xf32>
    %50 = vector.multi_reduction <add>, %49, %cst_20 [2] : vector<2x8x8xf32> to vector<2x8xf32>
    %51 = vector.shape_cast %50 : vector<2x8xf32> to vector<2x8x1xf32>
    %52 = tpu.reciprocal %51 {approx = true} : vector<2x8x1xf32> -> vector<2x8x1xf32>
    %53 = vector.broadcast %52 : vector<2x8x1xf32> to vector<2x8x8xf32>
    %54 = arith.mulf %49, %53 : vector<2x8x8xf32>
    %55 = arith.truncf %54 : vector<2x8x8xf32> to vector<2x8x8xbf16>
    "tpu.trace_start"() <{level = 10 : i32, message = "gnm,gmd->gnd"}> : () -> ()
    %cst_21 = arith.constant dense<0.000000e+00> : vector<2x8x16xf32>
    %56 = tpu.matmul %55, %41, %cst_21 {dimension_numbers = #tpu.dot_dimension_numbers<[2], [1], [1], [2], [0, 0, 0, 1, 1, 2], [0], [0]>} : vector<2x8x8xbf16>, vector<2x8x16xbf16>, vector<2x8x16xf32> -> vector<2x8x16xf32>
    "tpu.trace_stop"() : () -> ()
    %57 = vector.shape_cast %56 : vector<2x8x16xf32> to vector<16x16xf32>
    %58 = arith.truncf %57 : vector<16x16xf32> to vector<16x16xbf16>
    %c0_22 = arith.constant 0 : index
    %c0_23 = arith.constant 0 : index
    %59 = vector.load %arg15[%c0_22, %c0_23] : memref<16x32xbf16, #tpu.memory_space<vmem>>, vector<16x16xbf16>
    tpu.vector_store %arg15[%c0_22, %c0_23], %58 {strides = array<i32>} : memref<16x32xbf16, #tpu.memory_space<vmem>>, vector<16x16xbf16>,
    %60 = vector.extract_strided_slice %35 {offsets = [0, 16], sizes = [16, 16], strides = [1, 1]} : vector<16x96xbf16> to vector<16x16xbf16>
    %61 = vector.shape_cast %60 : vector<16x16xbf16> to vector<2x8x16xbf16>
    %62 = vector.extract_strided_slice %35 {offsets = [0, 48], sizes = [16, 16], strides = [1, 1]} : vector<16x96xbf16> to vector<16x16xbf16>
    %63 = vector.shape_cast %62 : vector<16x16xbf16> to vector<2x8x16xbf16>
    %64 = vector.extract_strided_slice %35 {offsets = [0, 80], sizes = [16, 16], strides = [1, 1]} : vector<16x96xbf16> to vector<16x16xbf16>
    %65 = vector.shape_cast %64 : vector<16x16xbf16> to vector<2x8x16xbf16>
    "tpu.trace_start"() <{level = 10 : i32, message = "gnd,gmd->gnm"}> : () -> ()
    %cst_24 = arith.constant dense<0.000000e+00> : vector<2x8x8xf32>
    %66 = tpu.matmul %61, %63, %cst_24 {dimension_numbers = #tpu.dot_dimension_numbers<[2], [2], [1], [1], [0, 0, 0, 1, 1, 1], [0], [0]>} : vector<2x8x16xbf16>, vector<2x8x16xbf16>, vector<2x8x8xf32> -> vector<2x8x8xf32>
    "tpu.trace_stop"() : () -> ()
    %cst_25 = arith.constant 2.500000e-01 : f32
    %67 = vector.broadcast %cst_25 : f32 to vector<2x8x8xf32>
    %68 = arith.mulf %66, %67 : vector<2x8x8xf32>
    %cst_26 = arith.constant dense<0xFF800000> : vector<2x8xf32>
    %69 = vector.multi_reduction <maximumf>, %68, %cst_26 [2] : vector<2x8x8xf32> to vector<2x8xf32>
    %70 = vector.shape_cast %69 : vector<2x8xf32> to vector<2x8x1xf32>
    %71 = vector.broadcast %70 : vector<2x8x1xf32> to vector<2x8x8xf32>
    %72 = arith.subf %68, %71 : vector<2x8x8xf32>
    %73 = math.exp %72 : vector<2x8x8xf32>
    %cst_27 = arith.constant dense<0.000000e+00> : vector<2x8xf32>
    %74 = vector.multi_reduction <add>, %73, %cst_27 [2] : vector<2x8x8xf32> to vector<2x8xf32>
    %75 = vector.shape_cast %74 : vector<2x8xf32> to vector<2x8x1xf32>
    %76 = tpu.reciprocal %75 {approx = true} : vector<2x8x1xf32> -> vector<2x8x1xf32>
    %77 = vector.broadcast %76 : vector<2x8x1xf32> to vector<2x8x8xf32>
    %78 = arith.mulf %73, %77 : vector<2x8x8xf32>
    %79 = arith.truncf %78 : vector<2x8x8xf32> to vector<2x8x8xbf16>
    "tpu.trace_start"() <{level = 10 : i32, message = "gnm,gmd->gnd"}> : () -> ()
    %cst_28 = arith.constant dense<0.000000e+00> : vector<2x8x16xf32>
    %80 = tpu.matmul %79, %65, %cst_28 {dimension_numbers = #tpu.dot_dimension_numbers<[2], [1], [1], [2], [0, 0, 0, 1, 1, 2], [0], [0]>} : vector<2x8x8xbf16>, vector<2x8x16xbf16>, vector<2x8x16xf32> -> vector<2x8x16xf32>
    "tpu.trace_stop"() : () -> ()
    %81 = vector.shape_cast %80 : vector<2x8x16xf32> to vector<16x16xf32>
    %82 = arith.truncf %81 : vector<16x16xf32> to vector<16x16xbf16>
    %c0_29 = arith.constant 0 : index
    %c16 = arith.constant 16 : index
    %83 = vector.load %arg15[%c0_29, %c16] : memref<16x32xbf16, #tpu.memory_space<vmem>>, vector<16x16xbf16>
    tpu.vector_store %arg15[%c0_29, %c16], %82 {strides = array<i32>} : memref<16x32xbf16, #tpu.memory_space<vmem>>, vector<16x16xbf16>,
    %c0_30 = arith.constant 0 : index
    %c0_31 = arith.constant 0 : index
    %84 = vector.load %arg15[%c0_30, %c0_31] : memref<16x32xbf16, #tpu.memory_space<vmem>>, vector<16x32xbf16>
    %c0_32 = arith.constant 0 : index
    %c0_33 = arith.constant 0 : index
    %c0_34 = arith.constant 0 : index
    %85 = vector.load %arg6[%c0_32, %c0_33, %c0_34] : memref<1x32x32xbf16, #tpu.memory_space<vmem>>, vector<1x32x32xbf16>
    %86 = vector.shape_cast %85 : vector<1x32x32xbf16> to vector<32x32xbf16>
    %cst_35 = arith.constant dense<0.000000e+00> : vector<16x32xf32>
    %87 = tpu.matmul %84, %86, %cst_35 {dimension_numbers = #tpu.dot_dimension_numbers<[1], [0], [0], [1], [0, 0, 1, 1], [], []>} : vector<16x32xbf16>, vector<32x32xbf16>, vector<16x32xf32> -> vector<16x32xf32>
    %88 = arith.addf %4, %87 : vector<16x32xf32>
    %c0_36 = arith.constant 0 : index
    %c0_37 = arith.constant 0 : index
    %c0_38 = arith.constant 0 : index
    %89 = vector.load %arg7[%c0_36, %c0_37, %c0_38] : memref<1x1x32xf32, #tpu.memory_space<vmem>>, vector<1x1x32xf32>
    %90 = vector.shape_cast %89 : vector<1x1x32xf32> to vector<1x32xf32>
    %91 = vector.broadcast %90 : vector<1x32xf32> to vector<16x32xf32>
    %92 = arith.addf %88, %91 : vector<16x32xf32>
    %cst_39 = arith.constant dense<0.000000e+00> : vector<16xf32>
    %93 = vector.multi_reduction <add>, %92, %cst_39 [1] : vector<16x32xf32> to vector<16xf32>
    %94 = vector.shape_cast %93 : vector<16xf32> to vector<16x1xf32>
    %cst_40 = arith.constant 3.200000e+01 : f32
    %95 = vector.broadcast %cst_40 : f32 to vector<16x1xf32>
    %96 = arith.divf %94, %95 : vector<16x1xf32>
    %97 = vector.broadcast %96 : vector<16x1xf32> to vector<16x32xf32>
    %98 = arith.subf %92, %97 : vector<16x32xf32>
    %99 = arith.mulf %98, %98 : vector<16x32xf32>
    %cst_41 = arith.constant dense<0.000000e+00> : vector<16xf32>
    %100 = vector.multi_reduction <add>, %99, %cst_41 [1] : vector<16x32xf32> to vector<16xf32>
    %101 = vector.shape_cast %100 : vector<16xf32> to vector<16x1xf32>
    %cst_42 = arith.constant 3.200000e+01 : f32
    %102 = vector.broadcast %cst_42 : f32 to vector<16x1xf32>
    %103 = arith.divf %101, %102 : vector<16x1xf32>
    %104 = vector.broadcast %96 : vector<16x1xf32> to vector<16x32xf32>
    %105 = arith.subf %92, %104 : vector<16x32xf32>
    %cst_43 = arith.constant 9.99999974E-6 : f32
    %106 = vector.broadcast %cst_43 : f32 to vector<16x1xf32>
    %107 = arith.addf %103, %106 : vector<16x1xf32>
    %108 = math.rsqrt %107 : vector<16x1xf32>
    %109 = vector.broadcast %108 : vector<16x1xf32> to vector<16x32xf32>
    %110 = arith.mulf %105, %109 : vector<16x32xf32>
    %c0_44 = arith.constant 0 : index
    %c0_45 = arith.constant 0 : index
    %c0_46 = arith.constant 0 : index
    %111 = vector.load %arg8[%c0_44, %c0_45, %c0_46] : memref<1x1x32xf32, #tpu.memory_space<vmem>>, vector<1x1x32xf32>
    %112 = vector.shape_cast %111 : vector<1x1x32xf32> to vector<1x32xf32>
    %113 = vector.broadcast %112 : vector<1x32xf32> to vector<16x32xf32>
    %114 = arith.mulf %110, %113 : vector<16x32xf32>
    %c0_47 = arith.constant 0 : index
    %c0_48 = arith.constant 0 : index
    %c0_49 = arith.constant 0 : index
    %115 = vector.load %arg9[%c0_47, %c0_48, %c0_49] : memref<1x1x32xf32, #tpu.memory_space<vmem>>, vector<1x1x32xf32>
    %116 = vector.shape_cast %115 : vector<1x1x32xf32> to vector<1x32xf32>
    %117 = vector.broadcast %116 : vector<1x32xf32> to vector<16x32xf32>
    %118 = arith.addf %114, %117 : vector<16x32xf32>
    %119 = arith.truncf %118 : vector<16x32xf32> to vector<16x32xbf16>
    %cst_50 = arith.constant 0.000000e+00 : f32
    %120 = vector.broadcast %cst_50 : f32 to vector<16x32xf32>
    %c0_i32_51 = arith.constant 0 : i32
    %c0_52 = arith.constant 0 : index
    %121 = arith.index_cast %c0_i32_51 : i32 to index
    %c0_53 = arith.constant 0 : index
    %c0_54 = arith.constant 0 : index
    %122 = vector.load %arg10[%c0_52, %121, %c0_53, %c0_54] : memref<1x1x32x64xbf16, #tpu.memory_space<vmem>>, vector<1x1x32x64xbf16>
    %123 = vector.shape_cast %122 : vector<1x1x32x64xbf16> to vector<32x64xbf16>
    %c0_55 = arith.constant 0 : index
    %124 = arith.index_cast %c0_i32_51 : i32 to index
    %c0_56 = arith.constant 0 : index
    %c0_57 = arith.constant 0 : index
    %125 = vector.load %arg11[%c0_55, %124, %c0_56, %c0_57] : memref<1x1x1x64xf32, #tpu.memory_space<vmem>>, vector<1x1x1x64xf32>
    %126 = vector.shape_cast %125 : vector<1x1x1x64xf32> to vector<1x64xf32>
    %c0_58 = arith.constant 0 : index
    %127 = arith.index_cast %c0_i32_51 : i32 to index
    %c0_59 = arith.constant 0 : index
    %c0_60 = arith.constant 0 : index
    %128 = vector.load %arg12[%c0_58, %127, %c0_59, %c0_60] : memref<1x1x64x32xbf16, #tpu.memory_space<vmem>>, vector<1x1x64x32xbf16>
    %129 = vector.shape_cast %128 : vector<1x1x64x32xbf16> to vector<64x32xbf16>
    %cst_61 = arith.constant dense<0.000000e+00> : vector<16x64xf32>
    %130 = tpu.matmul %119, %123, %cst_61 {dimension_numbers = #tpu.dot_dimension_numbers<[1], [0], [0], [1], [0, 0, 1, 1], [], []>} : vector<16x32xbf16>, vector<32x64xbf16>, vector<16x64xf32> -> vector<16x64xf32>
    %131 = vector.broadcast %126 : vector<1x64xf32> to vector<16x64xf32>
    %132 = arith.addf %130, %131 : vector<16x64xf32>
    %cst_62 = arith.constant 5.000000e-01 : f32
    %133 = vector.broadcast %cst_62 : f32 to vector<16x64xf32>
    %134 = arith.mulf %133, %132 : vector<16x64xf32>
    %cst_63 = arith.constant 4.471500e-02 : f32
    %135 = vector.broadcast %cst_63 : f32 to vector<16x64xf32>
    %136 = arith.mulf %135, %132 : vector<16x64xf32>
    %137 = arith.mulf %136, %132 : vector<16x64xf32>
    %138 = arith.mulf %137, %132 : vector<16x64xf32>
    %139 = arith.addf %132, %138 : vector<16x64xf32>
    %cst_64 = arith.constant 0.797884583 : f32
    %140 = vector.broadcast %cst_64 : f32 to vector<16x64xf32>
    %141 = arith.mulf %140, %139 : vector<16x64xf32>
    %142 = math.tanh %141 : vector<16x64xf32>
    %cst_65 = arith.constant 1.000000e+00 : f32
    %143 = vector.broadcast %cst_65 : f32 to vector<16x64xf32>
    %144 = arith.addf %143, %142 : vector<16x64xf32>
    %145 = arith.mulf %134, %144 : vector<16x64xf32>
    %146 = arith.truncf %145 : vector<16x64xf32> to vector<16x64xbf16>
    %cst_66 = arith.constant dense<0.000000e+00> : vector<16x32xf32>
    %147 = tpu.matmul %146, %129, %cst_66 {dimension_numbers = #tpu.dot_dimension_numbers<[1], [0], [0], [1], [0, 0, 1, 1], [], []>} : vector<16x64xbf16>, vector<64x32xbf16>, vector<16x32xf32> -> vector<16x32xf32>
    %148 = arith.addf %120, %147 : vector<16x32xf32>
    %c1_i32 = arith.constant 1 : i32
    %149 = arith.addf %92, %148 : vector<16x32xf32>
    %c0_67 = arith.constant 0 : index
    %c0_68 = arith.constant 0 : index
    %c0_69 = arith.constant 0 : index
    %150 = vector.load %arg13[%c0_67, %c0_68, %c0_69] : memref<1x1x32xf32, #tpu.memory_space<vmem>>, vector<1x1x32xf32>
    %151 = vector.shape_cast %150 : vector<1x1x32xf32> to vector<1x32xf32>
    %152 = vector.broadcast %151 : vector<1x32xf32> to vector<16x32xf32>
    %153 = arith.addf %149, %152 : vector<16x32xf32>
    %154 = vector.shape_cast %153 : vector<16x32xf32> to vector<2x8x32xf32>
    %c0_70 = arith.constant 0 : index
    %c0_71 = arith.constant 0 : index
    %c0_72 = arith.constant 0 : index
    %155 = vector.load %arg14[%c0_70, %c0_71, %c0_72] : memref<2x8x32xf32, #tpu.memory_space<vmem>>, vector<2x8x32xf32>
    tpu.vector_store %arg14[%c0_70, %c0_71, %c0_72], %154 {strides = array<i32>} : memref<2x8x32xf32, #tpu.memory_space<vmem>>, vector<2x8x32xf32>,
    return
  }
  func.func @transform_0(%arg0: i32, %arg1: i32) -> (i32, i32, i32) {
    %c0_i32 = arith.constant 0 : i32
    %c0_i32_0 = arith.constant 0 : i32
    %c0_i32_1 = arith.constant 0 : i32
    return %arg0, %c0_i32, %c0_i32_0 : i32, i32, i32
  }
  func.func @transform_1(%arg0: i32, %arg1: i32) -> (i32, i32, i32) {
    %c0_i32 = arith.constant 0 : i32
    %c0_i32_0 = arith.constant 0 : i32
    %c0_i32_1 = arith.constant 0 : i32
    return %arg1, %c0_i32, %c0_i32_0 : i32, i32, i32
  }
  func.func @transform_2(%arg0: i32, %arg1: i32) -> (i32, i32, i32) {
    %c0_i32 = arith.constant 0 : i32
    %c0_i32_0 = arith.constant 0 : i32
    %c0_i32_1 = arith.constant 0 : i32
    return %arg1, %c0_i32, %c0_i32_0 : i32, i32, i32
  }
  func.func @transform_3(%arg0: i32, %arg1: i32) -> (i32, i32, i32) {
    %c0_i32 = arith.constant 0 : i32
    %c0_i32_0 = arith.constant 0 : i32
    %c0_i32_1 = arith.constant 0 : i32
    return %arg1, %c0_i32, %c0_i32_0 : i32, i32, i32
  }
  func.func @transform_4(%arg0: i32, %arg1: i32) -> (i32, i32, i32) {
    %c0_i32 = arith.constant 0 : i32
    %c0_i32_0 = arith.constant 0 : i32
    %c0_i32_1 = arith.constant 0 : i32
    return %arg1, %c0_i32, %c0_i32_0 : i32, i32, i32
  }
  func.func @transform_5(%arg0: i32, %arg1: i32) -> (i32, i32, i32) {
    %c0_i32 = arith.constant 0 : i32
    %c0_i32_0 = arith.constant 0 : i32
    %c0_i32_1 = arith.constant 0 : i32
    return %arg1, %c0_i32, %c0_i32_0 : i32, i32, i32
  }
  func.func @transform_6(%arg0: i32, %arg1: i32) -> (i32, i32, i32) {
    %c0_i32 = arith.constant 0 : i32
    %c0_i32_0 = arith.constant 0 : i32
    %c0_i32_1 = arith.constant 0 : i32
    return %arg1, %c0_i32, %c0_i32_0 : i32, i32, i32
  }
  func.func @transform_7(%arg0: i32, %arg1: i32) -> (i32, i32, i32) {
    %c0_i32 = arith.constant 0 : i32
    %c0_i32_0 = arith.constant 0 : i32
    %c0_i32_1 = arith.constant 0 : i32
    return %arg1, %c0_i32, %c0_i32_0 : i32, i32, i32
  }
  func.func @transform_8(%arg0: i32, %arg1: i32) -> (i32, i32, i32, i32) {
    %c0_i32 = arith.constant 0 : i32
    %c0_i32_0 = arith.constant 0 : i32
    %c0_i32_1 = arith.constant 0 : i32
    %c0_i32_2 = arith.constant 0 : i32
    return %arg1, %c0_i32, %c0_i32_0, %c0_i32_1 : i32, i32, i32, i32
  }
  func.func @transform_9(%arg0: i32, %arg1: i32) -> (i32, i32, i32, i32) {
    %c0_i32 = arith.constant 0 : i32
    %c0_i32_0 = arith.constant 0 : i32
    %c0_i32_1 = arith.constant 0 : i32
    %c0_i32_2 = arith.constant 0 : i32
    return %arg1, %c0_i32, %c0_i32_0, %c0_i32_1 : i32, i32, i32, i32
  }
  func.func @transform_10(%arg0: i32, %arg1: i32) -> (i32, i32, i32, i32) {
    %c0_i32 = arith.constant 0 : i32
    %c0_i32_0 = arith.constant 0 : i32
    %c0_i32_1 = arith.constant 0 : i32
    %c0_i32_2 = arith.constant 0 : i32
    return %arg1, %c0_i32, %c0_i32_0, %c0_i32_1 : i32, i32, i32, i32
  }
  func.func @transform_11(%arg0: i32, %arg1: i32) -> (i32, i32, i32) {
    %c0_i32 = arith.constant 0 : i32
    %c0_i32_0 = arith.constant 0 : i32
    %c0_i32_1 = arith.constant 0 : i32
    return %arg1, %c0_i32, %c0_i32_0 : i32, i32, i32
  }
  func.func @transform_12(%arg0: i32, %arg1: i32) -> (i32, i32, i32) {
    %c0_i32 = arith.constant 0 : i32
    %c0_i32_0 = arith.constant 0 : i32
    %c0_i32_1 = arith.constant 0 : i32
    return %arg0, %c0_i32, %c0_i32_0 : i32, i32, i32
  }
}

</mosaic_0001>

<bundles_post_ra>
// kernel: tpu_custom_call.1
= control target key start
LH: loop header
LB: loop body
LE: loop exit
PB: predicated region body
PF: predicated region fallthrough
CT: control target
= control target key end

     0   :  { %s2490_s0 = inlined_call_operand.vmem [shape: f32[4,8,32], index: 0, kind: input, shape index: {}]   ;;  %s2491_s1 = inlined_call_operand.hbm [shape: f32[2,1,32], index: 1, kind: input, shape index: {}]   ;;  %s2492_s2 = inlined_call_operand.hbm [shape: f32[2,1,32], index: 2, kind: input, shape index: {}]   ;;  %s2493_s3 = inlined_call_operand.vmem [shape: bf16[2,32,96], index: 3, kind: input, shape index: {}]   ;;  %s2494_s4 = inlined_call_operand.vmem [shape: bf16[2,32,32], index: 4, kind: input, shape index: {}]   ;;  %s2495_s5 = inlined_call_operand.vmem [shape: f32[2,1,32], index: 5, kind: input, shape index: {}]   ;;  %s2496_s6 = inlined_call_operand.vmem [shape: f32[2,1,32], index: 6, kind: input, shape index: {}]   ;;  %s2497_s7 = inlined_call_operand.hbm [shape: f32[2,1,32], index: 7, kind: input, shape index: {}]   ;;  %s2498_s8 = inlined_call_operand.hbm [shape: bf16[2,1,32,64], index: 8, kind: input, shape index: {}]   ;;  %s2499_s9 = inlined_call_operand.vmem [shape: f32[2,1,1,64], index: 9, kind: input, shape index: {}]   ;;  %s2500_s10 = inlined_call_operand.vmem [shape: bf16[2,1,64,32], index: 10, kind: input, shape index: {}]   ;;  %s2501_s11 = inlined_call_operand.vmem [shape: f32[2,1,32], index: 11, kind: input, shape index: {}]   ;;  %s2502_s12 = inlined_call_operand.hbm [shape: f32[4,8,32], index: 12, kind: output, shape index: {}]  }
   0x1   :  { %2518 = sst [smem:[#allocation29_spill]] %s2490_s0 }
   0x2   :  { %2519 = sst [smem:[#allocation30_spill]] %s2491_s1 }
   0x3   :  { %2520 = sst [smem:[#allocation31_spill]] %s2492_s2 }
   0x4   :  { %2521 = sst [smem:[#allocation32_spill]] %s2493_s3 }
   0x5   :  { %2522 = sst [smem:[#allocation33_spill]] %s2494_s4 }
   0x6   :  { %2523 = sst [smem:[#allocation34_spill]] %s2496_s6 }
   0x7   :  { %2524 = sst [smem:[#allocation35_spill]] %s2497_s7 }
   0x8   :  { %2525 = sst [smem:[#allocation36_spill]] %s2498_s8 }
   0x9   :  { %2526 = sst [smem:[#allocation37_spill]] %s2499_s9 }
   0xa   :  { %2527 = sst [smem:[#allocation38_spill]] %s2500_s10 }
   0xb   :  { %2528 = sst [smem:[#allocation39_spill]] %s2501_s11 }
   0xc   :  { %2529 = sst [smem:[#allocation40_spill]] %s2502_s12 }
   0xd   :  { %17 = vsyncpa [#allocation4], 0 }
   0xe   :  { %19 = vsyncpa [#allocation4 + $0x1], 0 }
   0xf   :  { %20 = vsyncpa [#allocation7], 0 }
  0x10   :  { %22 = vsyncpa [#allocation7 + $0x1], 0 }
  0x11   :  { %23 = vsyncpa [#allocation10], 0 }
  0x12   :  { %25 = vsyncpa [#allocation10 + $0x1], 0 }
  0x13   :  { %26 = vsyncpa [#allocation5], 0 }
  0x14   :  { %28 = vsyncpa [#allocation5 + $0x1], 0  ;;  %s2098_s21 = smov 0   ;;  %s2100_s22 = smov 0  }
  0x15   :  { %s2102_s23 = smov 0   ;;  %s2104_s24 = smov 0  }
  0x16   :  { %s2106_s25 = smov 0   ;;  %s2108_s26 = smov 0  }
  0x17   :  { %s2110_s27 = smov 0   ;;  %s2112_s28 = smov 0  }
  0x18   :  { %s2114_s29 = smov 0   ;;  %s2116_s30 = smov 0  }
  0x19   :  { %s2118_s13 = smov 0  }
  0x1a LB: > { %2530 = sst [smem:[#allocation16_spill]] %s1980_s21  ;;  %s2152_s14 = sadd.s32 4294967295, %s2020_s13   ;;  %s2020_s13 = sphi %s2118_s13, %s34_s13   ;;  %s2016_s30 = sphi %s2116_s30, %s2580_s30   ;;  %s2012_s29 = sphi %s2114_s29, %s2579_s29   ;;  %s2008_s28 = sphi %s2112_s28, %s2578_s28   ;;  %s2004_s27 = sphi %s2110_s27, %s2577_s27   ;;  %s2000_s26 = sphi %s2108_s26, %s2576_s26   ;;  %s1996_s25 = sphi %s2106_s25, %s2575_s25   ;;  %s1992_s24 = sphi %s2104_s24, %s2574_s24   ;;  %s1988_s23 = sphi %s2102_s23, %s2573_s23   ;;  %s1984_s22 = sphi %s2100_s22, %s2582_s22   ;;  %s1980_s21 = sphi %s2098_s21, %s2581_s21  }
  0x1b   : > { %2531 = sst [smem:[#allocation17_spill]] %s1988_s23  ;;  %s1510_s15 = sadd.s32 4294967294, %s2020_s13  }
  0x1c   : > { %2532 = sst [smem:[#allocation18_spill]] %s1996_s25  ;;  %s43_s16 = sadd.s32 1, %s2012_s29 }
  0x1d   : > { %2533 = sst [smem:[#allocation19_spill]] %s2000_s26  ;;  %s46_s17 = sadd.s32 1, %s2016_s30 }
  0x1e   : > { %2534 = sst [smem:[#allocation20_spill]] %s2012_s29  ;;  %p44_p0 = scmp.ge.s32.totalorder %s43_s16, 2 }
  0x1f   : > { %2535 = sst [smem:[#allocation21_spill]] %s2016_s30  ;;  %s79_s18 = sadd.s32 1, %s2000_s26 }
  0x20   : > { %2536 = sst [smem:[#allocation22_spill]] %s2020_s13  ;;  %p86_p1 = scmp.ne.s32.totalorder %s2000_s26, %s1996_s25 }
  0x21   : > { %p87_p2 = scmp.eq.s32.totalorder %s2020_s13, 0  ;;  %s2584_s16 = smov (%p44_p0, %s43_s16), 0 }
  0x22   : > { %2537 = sst [smem:[#allocation23_spill]] %s2584_s16  ;;  %s2586_s17 = smov (!%p44_p0, %s46_s17), %s2016_s30 }
  0x23   : > { %s76_s19 = ssub.s32 %s2012_s29, %s2584_s16  ;;  %p2166_p3 = por %p87_p2, %p86_p1 }
  0x24   : > { %p48_p4 = scmp.ge.s32.totalorder %s2586_s17, 2  ;;  %p77_p5 = scmp.eq.s32.totalorder %s76_s19, 0 }
  0x25   : > { %p92_p6 = scmp.ne.s32.totalorder %s1996_s25, %s1992_s24  ;;  %p93_p7 = scmp.eq.s32.totalorder %s2152_s14, 0 }
  0x26   : > { %s2588_s17 = smov (%p48_p4, %s2586_s17), 0  ;;  %s365_s10 = sadd.s32 1, %s1988_s23 }
  0x27   : > { %2539 = sst [smem:[#allocation24_spill]] %s2588_s17  ;;  %p2177_p8 = por %p93_p7, %p92_p6 }
  0x28   : > { %s2175_s12 = scalar_select %p77_p5, %s2000_s26, %s79_s18  }
  0x29   : > { %s362_s11 = ssub.s32 %s2016_s30, %s2588_s17  ;;  %p375_p10 = scmp.ne.s32.totalorder %s1988_s23, %s1984_s22 }
  0x2a   : > { %2540 = sst [smem:[#allocation25_spill]] %s2175_s12  ;;  %p363_p9 = scmp.eq.s32.totalorder %s362_s11, 0 }
  0x2b   : > { %p376_p11 = scmp.eq.s32.totalorder %s2152_s14, 3  ;;  %p381_p13 = scmp.ne.s32.totalorder %s1984_s22, %s1980_s21 }
  0x2c   : > { %s2188_s24 = scalar_select %p363_p9, %s1988_s23, %s365_s10  }
  0x2d   : > { %p2190_p12 = por %p376_p11, %p375_p10  ;;  %p382_p0 = scmp.eq.s32.totalorder %s1510_s15, 3 }
  0x2e   : > { %2542 = sst [smem:[#allocation26_spill]] %s2188_s24  ;;  %p1632_p1 = scmp.lt.s32.totalorder %s2020_s13, 4 }
  0x2f   : > { %s2543_s19 = scalar_select %p2190_p12, 1, 0 }
  0x30   : > { %s2198_s18 = sand.u32 1, %s2000_s26   ;;  %p2200_p2 = por %p382_p0, %p381_p13 }
  0x31   : > { %2544 = sst [smem:[#allocation27_spill]] %s2543_s19  ;;  %s428_s17 = sand.u32 1, %s2020_s13  }
  0x32   : > { %s2545_s11 = scalar_select %p2200_p2, 1, 0 }
  0x33   : > { %p2207_p4 = pnand %p1632_p1, %p2166_p3  ;;  %s2548_s2 = sld [smem:[#allocation31_spill]] }
  0x34   : > { %2546 = sst [smem:[#allocation28_spill]] %s2545_s11  ;;  %s431_s26 = scalar_lea.vmem [#allocation6], %s2198_s18 }
  0x35   : > { %s438_s23 = sshll.u32 %s431_s26, 4  ;;  %p1516_p5 = scmp.ge.s32.totalorder %s2020_s13, 1  ;;  %s439_s23 = int_to_ptr.vmem [resolvable:$true] %s438_s23 }
  0x36   : > { %s429_s20 = scalar_lea.sflag [#allocation7], %s428_s17  ;;  %p530_p3 = scmp.lt.s32.totalorder %s2020_s13, 5 }
  0x37   : > { %s2550_s1 = sld [smem:[#allocation30_spill]]  ;;  %s412_s17 = scalar_lea.sflag [#allocation4], %s2198_s18 }
  0x38   : > { %p2220_p6 = pnand %p1516_p5, %p530_p3  ;;  %s2551_s7 = sld [smem:[#allocation35_spill]] }
  0x39   : > { %s434_s15 = scalar_lea.hbm %s2548_s2, %s2012_s29  ;;  %s414_s2 = scalar_lea.vmem [#allocation3], %s2198_s18 }
  0x3a   : > { %s436_s24 = sshll.u32 %s434_s15, 4  ;;  %s421_s26 = sshll.u32 %s414_s2, 4  ;;  %s437_s24 = int_to_ptr.hbm [resolvable:$true] %s436_s24  ;;  %s422_s26 = int_to_ptr.vmem [resolvable:$true] %s421_s26 }
  0x3b   : > { %1621 = dma.hbm_to_vmem [thread:$0]  (!%p2207_p4), %s437_s24, 16, %s439_s23, %s429_s20  }
  0x3c   : > { %s476_s19 = scalar_lea.vmem [#allocation8], %s2198_s18  ;;  %s1513_s2 = sshll.u32 %s2198_s18, 4 }
  0x3d   : > { %s417_s15 = scalar_lea.hbm %s2550_s1, %s2012_s29  ;;  %s483_s9 = sshll.u32 %s476_s19, 4  ;;  %s484_s9 = int_to_ptr.vmem [resolvable:$true] %s483_s9 }
  0x3e   : > { %s419_s21 = sshll.u32 %s417_s15, 4  ;;  %s479_s13 = scalar_lea.hbm %s2551_s7, %s2012_s29  ;;  %s420_s21 = int_to_ptr.hbm [resolvable:$true] %s419_s21 }
  0x3f   : > { %1618 = dma.hbm_to_vmem [thread:$0]  (!%p2207_p4), %s420_s21, 16, %s422_s26, %s412_s17  }
  0x40   : > { %s481_s12 = sshll.u32 %s479_s13, 4  ;;  %s1589_s30 = sshll.u32 %s2012_s29, 4  ;;  %s482_s12 = int_to_ptr.hbm [resolvable:$true] %s481_s12 }
  0x41   : > { %1624 = dma.hbm_to_vmem [thread:$0]  (!%p2207_p4), %s482_s12, 16, %s484_s9, %s429_s20  }
  0x42   : > { %s2552_s8 = sld [smem:[#allocation36_spill]]  ;;  %s494_s26 = scalar_lea.vmem [#allocation9], %s1513_s2 }
  0x43   : > { %s502_s17 = sshll.u32 %s494_s26, 4  ;;  %s491_s23 = scalar_lea.sflag [#allocation10], %s2198_s18  ;;  %s503_s17 = int_to_ptr.vmem [resolvable:$true] %s502_s17 }
  0x44   : > { %s2022_s24 = smov 64   ;;  %s2023_s19 = smov 4  }
  0x45   : > { %s2250_s9 = sand.u32 (!%p2220_p6), 1, %s1996_s25  }
  0x46   : > { %534 = sbr.rel (%p2220_p6) target bundleno = 1998 (0x7ce), region = 68  ;;  %s537_s1 = scalar_lea.sflag (!%p2220_p6), [#allocation4], %s2250_s9 }
  0x48   : > { %s499_s6 = scalar_lea.hbm %s2552_s8, %s1589_s30 }
  0x49   : > { %s500_s21 = sshll.u32 %s499_s6, 4  ;;  %s501_s21 = int_to_ptr.hbm [resolvable:$true] %s500_s21 }
  0x4a   : > { %1627 = dma.hbm_to_vmem [thread:$0]  (!%p2207_p4), %s501_s21, 256, %s503_s17, %s491_s23, %s2022_s24, %s2022_s24, %s2023_s19  }
  0x4b   : > { %1963 = dma.done.wait (%p2177_p8), %s537_s1, 16  }
  0x4c   : > { %1965 = vsyncadd (%p2177_p8), %s537_s1, 4294967280  ;;  %s545_s13 = sand.u32 1, %s2152_s14  }
  0x4d   : > { %s546_s18 = scalar_lea.sflag [#allocation7], %s545_s13 }
  0x4e   : > { %1967 = dma.done.wait (%p2177_p8), %s546_s18, 32  }
  0x4f   : > { %1969 = vsyncadd (%p2177_p8), %s546_s18, 4294967264  ;;  %s1517_s10 = sshll.u32 %s2250_s9, 4  ;;  %s564_s12 = scalar_lea.sflag [#allocation10], %s2250_s9 }
  0x50   : > { %s2267_s2 = scalar_lea.vmem [#allocation9], %s1517_s10 }
  0x51   : > { %1971 = dma.done.wait (%p2177_p8), %s564_s12, 256  }
  0x52   : > { %1973 = vsyncadd (%p2177_p8), %s564_s12, 4294967040  ;;  %s2515_s14 = sand.u32 1, %s1984_s22   ;;  %s1519_s30 = sshll.u32 %s2008_s28, 1 }
  0x53   : > { %s1518_s15 = sshll.u32 %s2515_s14, 4  ;;  %p654_p7 = scmp.lt.s32.totalorder %s1519_s30, 3 }
  0x54   : > { %p659_p9 = scmp.lt.s32.totalorder %s2004_s27, 1  ;;  %s2553_s0 = sld [smem:[#allocation29_spill]] }
  0x55   : > { %s2590_s30 = smov (!%p654_p7, %s1519_s30), 3  ;;  %s2554_s3 = sld [smem:[#allocation32_spill]] }
  0x56   : > { %s2279_s21 = scalar_select %p659_p9, %s2004_s27, 1 }
  0x57   : > { %s1520_s16 = sshll.u32 %s2590_s30, 3  ;;  %s2555_s4 = sld [smem:[#allocation33_spill]] }
  0x58   : > { %s1590_s24 = sshll.u32 %s2279_s21, 4  ;;  %s671_s11 = scalar_lea.vmem %s2495_s5, %s2279_s21 }
  0x59   : > { %s2556_s7 = sld [smem:[#allocation34_spill]]  ;;  %s1592_s19 = sshll.u32 %s2279_s21, 5 }
  0x5a   : > { %s657_s23 = scalar_lea.vmem %s2553_s0, %s1520_s16  ;;  %s2557_s0 = sld [smem:[#allocation37_spill]] }
  0x5b   : > { %s2288_s13 = scalar_lea.vmem %s2554_s3, %s1590_s24  ;;  %s2558_s29 = sld [smem:[#allocation38_spill]] }
  0x5c   : > { %s2559_s10 = sld [smem:[#allocation39_spill]]  ;;  %s2317_s20 = scalar_lea.vmem [#allocation11], %s1518_s15 }
  0x5d   : > { %s2293_s12 = scalar_lea.vmem %s2555_s4, %s1590_s24  ;;  %p1527_p8 = scmp.ne.s32.totalorder %s2004_s27, 0 }
  0x5f   : > { %s674_s26 = scalar_lea.vmem %s2556_s7, %s2279_s21  ;;  %691 = sbr.rel (%p1527_p8) target bundleno = 103 (0x67), region = 88 }
  0x60   : > { %s677_s8 = scalar_lea.vmem %s2557_s0, %s2279_s21 }
  0x61   : > { %s2311_s25 = scalar_lea.vmem %s2558_s29, %s1592_s19 }
  0x62   : > { %s685_s4 = scalar_lea.vmem %s2559_s10, %s2279_s21 }
  0x64   : > { %v692_v0 = vld [vmem:[%s657_s23] sm:$0xff]  ;;  %vm694_vm0 = vcmask 261120   ;;  %v693_v1 = vld [vmem:[%s657_s23 + $0x8] sm:$0xff] }
  0x65   : > { %695 = vst.msk [vmem:[%s2317_s20] sm:$0xff] %vm694_vm0, %v692_v0 }
  0x66   : > { %696 = vst.msk [vmem:[%s2317_s20 + $0x8] sm:$0xff] %vm694_vm0, %v693_v1 }
  0x67 PF: > { %vm699_vm1 = vcmask 261120   ;;  %v2024_v6 = vmov 32.0   ;;  %v1594_v23 = vld [vmem:[%s2288_s13 + $0x8] sm:$0xff]  ;;  %v1593_v25 = vld [vmem:[%s2288_s13] sm:$0xff]  ;;  %s2560_s0 = scalar_lea.vmem [#allocation3], %s2250_s9  ;;  %s2561_s3 = scalar_lea.vmem [#allocation6], %s2250_s9 }
  0x68   : > { %1740 = vrcp.f32 %v2024_v6  ;;  %789 = vmatpush.bf16.msra.mxu0 %v1594_v23  ;;  %v1733_v44 = vld [vmem:[%s2560_s0] ss:$0 sm:$0xff]  ;;  %s2025_s7 = smov 80   ;;  %s2026_s27 = smov 96   ;;  %vm804_vm9 = vcmask 130048   ;;  %vm850_vm10 = vcmask 64512  }
  0x69   : > { %v1734_v49 = vld [vmem:[%s2561_s3] ss:$0 sm:$0xff]  ;;  %s2027_s29 = smov 112   ;;  %s2028_s6 = smov 64   ;;  %vm880_vm11 = vcmask 1043456   ;;  %vm920_vm12 = vcmask 125952  }
  0x6a   : > { %s2029_s14 = smov 48   ;;  %s2030_s15 = smov 16   ;;  %vm1047_vm13 = vcmask 257152  }
  0x6b   : > { %s2563_s30 = scalar_lea.vmem [#allocation8], %s2250_s9  ;;  %s1604_s19 = sshll.u32 %s2008_s28, 4 }
  0x6c   : > { %v2323_v2 = vld [vmem:[%s2317_s20] sm:$0xff]  ;;  %790 = vmatpush.bf16.msra.mxu0 %v1593_v25  ;;  %s2566_s18 = sld [smem:[#allocation40_spill]]  ;;  %s1284_s3 = sshll.u32 %s2317_s20, 4  ;;  %s1285_s3 = int_to_ptr.vmem [resolvable:$true] %s1284_s3 }
  0x6d   : > { %v700_v3 = vsel %vm699_vm1, %v2323_v2, 0.0  ;;  %v2328_v4 = vld [vmem:[%s2317_s20 + $0x8] sm:$0xff] }
  0x6e   : > { %701 = vadd.xlane.f32.xlu0 %v700_v3  ;;  %v703_v5 = vsel %vm699_vm1, %v2328_v4, 0.0  ;;  %v1741_v7 = vpop.eup %1740 }
  0x6f   : > { %v707_v8 = vmul.f32 32.0, %v1741_v7  ;;  %vm711_vm2 = vweird.f32 %v1741_v7 }
  0x71   : > { %v708_v9 = vsub.f32 1.0, %v707_v8 }
  0x72   : > { %s1283_s0 = scalar_lea.hbm %s2566_s18, %s1604_s19 }
  0x73   : > { %v709_v10 = vmul.f32 %v1741_v7, %v708_v9 }
  0x75   : > { %v710_v11 = vadd.f32 %v1741_v7, %v709_v10 }
  0x76   : > { %704 = vadd.xlane.f32.xlu0 %v703_v5 }
  0x77   : > { %v2332_v12 = vsel %vm711_vm2, %v1741_v7, %v710_v11 }
  0xe1   : > { %v702_v13 = vpop.xlane.xlu0 %701 }
  0xe2   : > { %v713_v14 = vmul.f32 %v2332_v12, %v702_v13 }
  0xe4   : > { %v715_v15 = vsub.f32 %v2323_v2, %v713_v14 }
  0xe6   : > { %v717_v16 = vmul.f32 %v715_v15, %v715_v15 }
  0xe8   : > { %v719_v17 = vsel %vm699_vm1, %v717_v16, 0.0 }
  0xe9   : > { %720 = vadd.xlane.f32.xlu1 %v719_v17  ;;  %v705_v18 = vpop.xlane.xlu0 %704 }
  0xea   : > { %v714_v19 = vmul.f32 %v2332_v12, %v705_v18 }
  0xec   : > { %v716_v20 = vsub.f32 %v2328_v4, %v714_v19 }
  0xee   : > { %v718_v21 = vmul.f32 %v716_v20, %v716_v20 }
  0xf0   : > { %v722_v22 = vsel %vm699_vm1, %v718_v21, 0.0 }
  0xf1   : > { %723 = vadd.xlane.f32.xlu1 %v722_v22 }
 0x15c   : > { %v721_v24 = vpop.xlane.xlu1 %720 }
 0x15d   : > { %v725_v26 = vmul.f32 %v721_v24, %v2332_v12 }
 0x15f   : > { %v727_v27 = vadd.f32 1e-05, %v725_v26 }
 0x161   : > { %1742 = vrsqrt.f32 %v727_v27  ;;  %vm735_vm4 = vweird.f32 %v727_v27 }
 0x164   : > { %v724_v28 = vpop.xlane.xlu1 %723 }
 0x165   : > { %v726_v29 = vmul.f32 %v724_v28, %v2332_v12 }
 0x167   : > { %v1743_v30 = vpop.eup %1742  ;;  %v728_v31 = vadd.f32 1e-05, %v726_v29 }
 0x168   : > { %v730_v32 = vmul.f32 %v1743_v30, %v727_v27  ;;  %vm736_vm3 = vweird.f32 %v1743_v30 }
 0x169   : > { %1744 = vrsqrt.f32 %v728_v31  ;;  %vm737_vm5 = vmor %vm735_vm4, %vm736_vm3  ;;  %vm745_vm7 = vweird.f32 %v728_v31 }
 0x16a   : > { %v731_v33 = vmul.f32 %v1743_v30, %v730_v32 }
 0x16c   : > { %v732_v34 = vmul.f32 0.5, %v731_v33 }
 0x16e   : > { %v733_v35 = vsub.f32 1.5, %v732_v34 }
 0x16f   : > { %v1745_v36 = vpop.eup %1744 }
 0x170   : > { %v734_v37 = vmul.f32 %v1743_v30, %v733_v35  ;;  %v740_v38 = vmul.f32 %v1745_v36, %v728_v31  ;;  %vm746_vm6 = vweird.f32 %v1745_v36 }
 0x171   : > { %vm747_vm8 = vmor %vm745_vm7, %vm746_vm6 }
 0x172   : > { %v741_v39 = vmul.f32 %v1745_v36, %v740_v38  ;;  %v738_v40 = vsel %vm737_vm5, %v1743_v30, %v734_v37  ;;  %vm1243_vm5 = vcmask 523264  }
 0x173   : > { %v749_v43 = vmul.f32 %v738_v40, %v715_v15 }
 0x174   : > { %v742_v41 = vmul.f32 0.5, %v741_v39 }
 0x175   : > { %v755_v48 = vmul.f32 %v1733_v44, %v749_v43 }
 0x176   : > { %v743_v42 = vsub.f32 1.5, %v742_v41 }
 0x177   : > { %v761_v51 = vadd.f32 %v1734_v49, %v755_v48 }
 0x178   : > { %v744_v45 = vmul.f32 %v1745_v36, %v743_v42 }
 0x17a   : > { %v748_v46 = vsel %vm747_vm8, %v1745_v36, %v744_v45 }
 0x17b   : > { %v750_v47 = vmul.f32 %v748_v46, %v716_v20 }
 0x17d   : > { %v756_v50 = vmul.f32 %v1733_v44, %v750_v47 }
 0x17f   : > { %v762_v52 = vadd.f32 %v1734_v49, %v756_v50 }
 0x181   : > { %v763_v53 = vpack.c.bf16 %v762_v52, %v761_v51 }
 0x183   : > { %1536 = vmatmul.msk.bf16.vlgmr.msra.gmra.mxu0 %vm699_vm1, %v763_v53 }
 0x200   : > { %v792_v54 = vpop.f32.mrf.mxu0 }
 0x201   : > { %v797_v55 = vpack.c.bf16 %v792_v54, %v792_v54 }
 0x203   : > { %v800_v56 = vunpack.c.l.b16 %v797_v55 }
 0x205   : > { %v801_v57 = vpack.c.b16 %v800_v56, %v800_v56 }
 0x207   : > { %925 = vrot.lane.b32.xlu0 %v801_v57, %s2025_s7  ;;  %802 = vrot.lane.b32.xlu2 %v801_v57, %s2026_s27 }
 0x208   : > { %v794_v58 = vpop.f32.mrf.mxu0 }
 0x209   : > { %v798_v59 = vpack.c.bf16 %v794_v58, %v794_v58 }
 0x20b   : > { %v825_v60 = vunpack.c.l.b16 %v798_v59 }
 0x20d   : > { %v2349_v61 = vpack.c.b16 %v825_v60, %v825_v60 }
 0x20f   : > { %948 = vrot.lane.b32.xlu1 %v2349_v61, %s2025_s7  ;;  %827 = vrot.lane.b32.xlu2 %v2349_v61, %s2026_s27  ;;  %s1286_s7 = sshll.u32 %s1283_s0, 4  ;;  %s1287_s7 = int_to_ptr.hbm [resolvable:$true] %s1286_s7 }
 0x210   : > { %s1904_s21 = sshra.s32 %s1287_s7, 4  ;;  %s1905_s21 = int_to_ptr.hbm [resolvable:$true] %s1904_s21 }
 0x211   : > { %s1906_s27 = scalar_lea.hbm %s1905_s21, 16  ;;  %p1911_p0 = scmp.lt.s32.totalorder %s1905_s21, %s2566_s18 }
 0x212   : > { %p1907_p10 = scmp.ne.s32.totalorder %s1905_s21, %s1906_s27 }
 0x214   : > { %p1908_p11 = pnand %p1907_p10, %p2190_p12 }
 0x216   : > { %p1909_p13 = pneg %p1908_p11 }
 0x217   : > { %923 = vrot.lane.b32.xlu2 %v801_v57, %s2027_s29 }
 0x21f   : > { %946 = vrot.lane.b32.xlu2 %v2349_v61, %s2027_s29 }
 0x261   : > { %v803_v62 = vpop.permute.xlu2 %802 }
 0x262   : > { %v809_v63 = vsel %vm804_vm9, %v803_v62, 0 }
 0x263   : > { %818 = vmatpush.bf16.xpose.msra.mxu1 %v809_v63 }
 0x269   : > { %v828_v0 = vpop.permute.xlu2 %827 }
 0x26a   : > { %1537 = vmatmul.msk.bf16.vlgmr.msra.gmra.mxu1 %vm804_vm9, %v797_v55  ;;  %v833_v1 = vsel %vm804_vm9, %v828_v0, 0 }
 0x26b   : > { %842 = vmatpush.bf16.xpose.msra.mxu2 %v833_v1 }
 0x271   : > { %v924_v6 = vpop.permute.xlu2 %923 }
 0x272   : > { %1538 = vmatmul.msk.bf16.vlgmr.msra.gmra.mxu2 %vm804_vm9, %v798_v59 }
 0x279   : > { %v926_v3 = vpop.permute.xlu0 %925  ;;  %v947_v9 = vpop.permute.xlu2 %946 }
 0x27a   : > { %v931_v5 = vsel %vm804_vm9, %v926_v3, 0 }
 0x27b   : > { %940 = vmatpush.bf16.xpose.msrb.mxu0 %v931_v5 }
 0x281   : > { %v949_v7 = vpop.permute.xlu1 %948 }
 0x282   : > { %1541 = vmatmul.msk.bf16.vlgmr.msrb.gmra.mxu0 %vm804_vm9, %v924_v6  ;;  %v954_v8 = vsel %vm804_vm9, %v949_v7, 0 }
 0x283   : > { %963 = vmatpush.bf16.xpose.msrb.mxu1 %v954_v8 }
 0x28a   : > { %1542 = vmatmul.msk.bf16.vlgmr.msrb.gmra.mxu1 %vm804_vm9, %v947_v9 }
 0x2e7   : > { %v820_v10 = vpop.f32.mrf.mxu1 }
 0x2e8   : > { %v848_v11 = vmul.f32 0.25, %v820_v10 }
 0x2ea   : > { %v851_v13 = vsel %vm850_vm10, %v848_v11, -inf }
 0x2eb   : > { %852 = vmax.xlane.f32.xlu2 %v851_v13 }
 0x2ef   : > { %v822_v14 = vpop.f32.mrf.mxu1 }
 0x2f5   : > { %v844_v15 = vpop.f32.mrf.mxu2 }
 0x2f6   : > { %v849_v16 = vmul.f32 0.25, %v844_v15 }
 0x2f8   : > { %v854_v17 = vsel %vm850_vm10, %v849_v16, -inf }
 0x2f9   : > { %855 = vmax.xlane.f32.xlu0 %v854_v17 }
 0x2fd   : > { %v846_v18 = vpop.f32.mrf.mxu2 }
 0x2ff   : > { %v942_v19 = vpop.f32.mrf.mxu0 }
 0x300   : > { %v969_v20 = vmul.f32 0.25, %v942_v19 }
 0x302   : > { %v971_v21 = vsel %vm850_vm10, %v969_v20, -inf }
 0x303   : > { %972 = vmax.xlane.f32.xlu1 %v971_v21 }
 0x307   : > { %v944_v22 = vpop.f32.mrf.mxu0  ;;  %v965_v23 = vpop.f32.mrf.mxu1 }
 0x308   : > { %v970_v24 = vmul.f32 0.25, %v965_v23  ;;  %v1597_v22 = vld [vmem:[%s2293_s12 + $0x8] sm:$0xff]  ;;  %v1596_v23 = vld [vmem:[%s2293_s12] sm:$0xff] }
 0x309   : > { %1082 = vmatpush.bf16.msra.mxu0 %v1597_v22 }
 0x30a   : > { %v974_v25 = vsel %vm850_vm10, %v970_v24, -inf }
 0x30b   : > { %975 = vmax.xlane.f32.xlu2 %v974_v25 }
 0x30d   : > { %897 = vrot.lane.b32.xlu0 %v2349_v61, %s2028_s6  ;;  %1083 = vmatpush.bf16.msra.mxu0 %v1596_v23 }
 0x30f   : > { %v967_v26 = vpop.f32.mrf.mxu1 }
 0x323   : > { %875 = vrot.lane.b32.xlu2 %v801_v57, %s2028_s6 }
 0x32b   : > { %995 = vrot.lane.b32.xlu2 %v801_v57, %s2029_s14 }
 0x35e   : > { %v853_v27 = vpop.xlane.xlu2 %852 }
 0x35f   : > { %v857_v28 = vsub.f32 %v848_v11, %v853_v27  ;;  %v1735_v27 = vld [vmem:[%s671_s11] ss:$0 sm:$0xff] }
 0x361   : > { %v859_v29 = vmul.f32 1.442695, %v857_v28 }
 0x363   : > { %1746 = vpow2.f32 %v859_v29 }
 0x369   : > { %v1747_v30 = vpop.eup %1746 }
 0x36a   : > { %v863_v31 = vsel %vm850_vm10, %v1747_v30, 0.0 }
 0x36b   : > { %864 = vadd.xlane.f32.xlu0 %v863_v31 }
 0x36c   : > { %v856_v32 = vpop.xlane.xlu0 %855 }
 0x36d   : > { %v858_v33 = vsub.f32 %v849_v16, %v856_v32 }
 0x36f   : > { %v861_v34 = vmul.f32 1.442695, %v858_v33 }
 0x371   : > { %1748 = vpow2.f32 %v861_v34 }
 0x376   : > { %v973_v35 = vpop.xlane.xlu1 %972 }
 0x377   : > { %v1749_v36 = vpop.eup %1748  ;;  %v977_v37 = vsub.f32 %v969_v20, %v973_v35 }
 0x378   : > { %v866_v38 = vsel %vm850_vm10, %v1749_v36, 0.0 }
 0x379   : > { %v979_v39 = vmul.f32 1.442695, %v977_v37  ;;  %867 = vadd.xlane.f32.xlu1 %v866_v38 }
 0x37b   : > { %1750 = vpow2.f32 %v979_v39 }
 0x37e   : > { %v976_v40 = vpop.xlane.xlu2 %975 }
 0x37f   : > { %v978_v41 = vsub.f32 %v970_v24, %v976_v40  ;;  %1016 = vrot.lane.b32.xlu0 %v2349_v61, %s2029_s14  ;;  %v898_v45 = vpop.permute.xlu0 %897  ;;  %s1910_s14 = scalar_lea.hbm %s2566_s18, 32 }
 0x380   : > { %v903_v48 = vsel %vm880_vm11, %v898_v45, 0  ;;  %p1912_p1 = scmp.lt.s32.totalorder %s1910_s14, %s1906_s27 }
 0x381   : > { %v1751_v42 = vpop.eup %1750  ;;  %v981_v43 = vmul.f32 1.442695, %v978_v41 }
 0x382   : > { %v983_v44 = vsel %vm850_vm10, %v1751_v42, 0.0  ;;  %p1913_p4 = por %p1912_p1, %p1911_p0 }
 0x383   : > { %1752 = vpow2.f32 %v981_v43  ;;  %984 = vadd.xlane.f32.xlu1 %v983_v44  ;;  %v1599_v44 = vld [vmem:[%s2267_s2 + $0x8] sm:$0xff] }
 0x384   : > { %1192 = vmatpush.bf16.msra.mxu1 %v1599_v44  ;;  %p1914_p5 = pnand %p1913_p4, %p1909_p13 }
 0x386   : > { %v876_v46 = vpop.permute.xlu2 %875 }
 0x387   : > { %v882_v47 = vsel %vm880_vm11, %v876_v46, 0 }
 0x388   : > { %891 = vmatpush.bf16.msra.mxu3 %v882_v47  ;;  %v1598_v47 = vld [vmem:[%s2267_s2] sm:$0xff] }
 0x389   : > { %v1753_v49 = vpop.eup %1752  ;;  %1193 = vmatpush.bf16.msra.mxu1 %v1598_v47 }
 0x38a   : > { %v986_v50 = vsel %vm850_vm10, %v1753_v49, 0.0 }
 0x38b   : > { %987 = vadd.xlane.f32.xlu1 %v986_v50 }
 0x38c   : > { %912 = vmatpush.bf16.msrb.mxu3 %v903_v48 }
 0x38e   : > { %v996_v51 = vpop.permute.xlu2 %995 }
 0x38f   : > { %v1001_v52 = vsel %vm880_vm11, %v996_v51, 0 }
 0x390   : > { %1010 = vmatpush.bf16.msrb.mxu2 %v1001_v52 }
 0x3de   : > { %v865_v53 = vpop.xlane.xlu0 %864 }
 0x3df   : > { %1754 = vrcp.f32 %v865_v53 }
 0x3e5   : > { %v1755_v54 = vpop.eup %1754 }
 0x3e6   : > { %v871_v55 = vmul.f32 %v1755_v54, %v1747_v30 }
 0x3e8   : > { %v873_v56 = vpack.c.bf16 %v871_v55, %v871_v55 }
 0x3ea   : > { %1539 = vmatmul.msk.bf16.vlgmr.msra.gmra.mxu3 %vm850_vm10, %v873_v56 }
 0x3ec   : > { %v868_v57 = vpop.xlane.xlu1 %867 }
 0x3ed   : > { %1756 = vrcp.f32 %v868_v57 }
 0x3f1   : > { %v1017_v58 = vpop.permute.xlu0 %1016 }
 0x3f2   : > { %v1022_v59 = vsel %vm880_vm11, %v1017_v58, 0 }
 0x3f3   : > { %v1757_v60 = vpop.eup %1756  ;;  %1031 = vmatpush.bf16.msra.mxu3 %v1022_v59 }
 0x3f4   : > { %v872_v61 = vmul.f32 %v1757_v60, %v1749_v36 }
 0x3f6   : > { %v985_v62 = vpop.xlane.xlu1 %984  ;;  %v874_v63 = vpack.c.bf16 %v872_v61, %v872_v61 }
 0x3f7   : > { %1758 = vrcp.f32 %v985_v62 }
 0x3fa   : > { %1540 = vmatmul.msk.bf16.vlgmr.msrb.gmra.mxu3 %vm850_vm10, %v874_v63 }
 0x3fd   : > { %v1759_v0 = vpop.eup %1758 }
 0x3fe   : > { %v991_v1 = vmul.f32 %v1759_v0, %v1751_v42  ;;  %v988_v3 = vpop.xlane.xlu1 %987 }
 0x3ff   : > { %1760 = vrcp.f32 %v988_v3 }
 0x400   : > { %v993_v5 = vpack.c.bf16 %v991_v1, %v991_v1 }
 0x402   : > { %1543 = vmatmul.msk.bf16.vlgmr.msrb.gmra.mxu2 %vm850_vm10, %v993_v5  ;;  %v1737_v5 = vld [vmem:[%s2563_s30] ss:$0 sm:$0xff] }
 0x405   : > { %v1761_v6 = vpop.eup %1760 }
 0x406   : > { %v992_v7 = vmul.f32 %v1761_v6, %v1753_v49 }
 0x408   : > { %v994_v8 = vpack.c.bf16 %v992_v7, %v992_v7 }
 0x40a   : > { %1544 = vmatmul.msk.bf16.vlgmr.msra.gmra.mxu3 %vm850_vm10, %v994_v8 }
 0x46d   : > { %v893_v9 = vpop.f32.mrf.mxu3 }
 0x46e   : > { %v918_v10 = vpack.c.bf16 %v893_v9, %v893_v9 }
 0x470   : > { %921 = vst.msk [vmem:[#allocation2] sm:$0xf] %vm920_vm12, %v918_v10 }
 0x475   : > { %v895_v11 = vpop.f32.mrf.mxu3 }
 0x47d   : > { %v914_v13 = vpop.f32.mrf.mxu3 }
 0x47e   : > { %v919_v14 = vpack.c.bf16 %v914_v13, %v914_v13  ;;  %v1603_v13 = vld [vmem:[%s2311_s25 + $0x18] sm:$0xff] }
 0x47f   : > { %1251 = vmatpush.bf16.msra.mxu2 %v1603_v13 }
 0x480   : > { %922 = vst.msk [vmem:[#allocation2 + $0x4] sm:$0xf] %vm920_vm12, %v919_v14  ;;  %v1602_v14 = vld [vmem:[%s2311_s25 + $0x10] sm:$0xff] }
 0x483   : > { %1252 = vmatpush.bf16.msra.mxu2 %v1602_v14 }
 0x485   : > { %v916_v15 = vpop.f32.mrf.mxu3  ;;  %v1012_v16 = vpop.f32.mrf.mxu2 }
 0x486   : > { %v1037_v17 = vpack.c.bf16 %v1012_v16, %v1012_v16  ;;  %v1601_v15 = vld [vmem:[%s2311_s25 + $0x8] sm:$0xff]  ;;  %v1600_v16 = vld [vmem:[%s2311_s25] sm:$0xff] }
 0x487   : > { %1253 = vmatpush.bf16.msra.mxu2 %v1601_v15 }
 0x488   : > { %1041 = vrot.lane.b32.xlu1 %v1037_v17, %s2030_s15  ;;  %v1738_v17 = vld [vmem:[%s677_s8] ss:$0 sm:$0xff] }
 0x48b   : > { %1254 = vmatpush.bf16.msra.mxu2 %v1600_v16 }
 0x48d   : > { %v1014_v18 = vpop.f32.mrf.mxu2  ;;  %v1033_v19 = vpop.f32.mrf.mxu3 }
 0x48e   : > { %v1038_v20 = vpack.c.bf16 %v1033_v19, %v1033_v19 }
 0x490   : > { %1043 = vrot.lane.b32.xlu2 %v1038_v20, %s2030_s15 }
 0x495   : > { %v1035_v21 = vpop.f32.mrf.mxu3 }
 0x4ea   : > { %v1044_v24 = vpop.permute.xlu2 %1043 }
 0x4eb   : > { %1049 = vst.msk [vmem:[#allocation2 + $0x4] sm:$0xf] %vm1047_vm13, %v1044_v24 }
 0x4fa   : > { %v1042_v25 = vpop.permute.xlu1 %1041 }
 0x4fb   : > { %1048 = vst.msk [vmem:[#allocation2] sm:$0xf] %vm1047_vm13, %v1042_v25 }
 0x502   : > { %v1595_v26 = vld [vmem:[#allocation2] sm:$0xff] }
 0x503   : > { %1557 = vmatmul.msk.bf16.vlgmr.msra.gmra.mxu0 %vm699_vm1, %v1595_v26 }
 0x580   : > { %v1085_v28 = vpop.f32.mrf.mxu0 }
 0x581   : > { %v1090_v29 = vadd.f32 %v1085_v28, %v2323_v2 }
 0x583   : > { %v2389_v30 = vadd.f32 %v1735_v27, %v1090_v29 }
 0x585   : > { %v1098_v31 = vsel %vm699_vm1, %v2389_v30, 0.0 }
 0x586   : > { %1099 = vadd.xlane.f32.xlu0 %v1098_v31 }
 0x588   : > { %v1087_v32 = vpop.f32.mrf.mxu0 }
 0x589   : > { %v1091_v33 = vadd.f32 %v1087_v32, %v2328_v4 }
 0x58b   : > { %v2394_v34 = vadd.f32 %v1735_v27, %v1091_v33 }
 0x58d   : > { %v1101_v35 = vsel %vm699_vm1, %v2394_v34, 0.0 }
 0x58e   : > { %1102 = vadd.xlane.f32.xlu2 %v1101_v35 }
 0x5f9   : > { %v1100_v36 = vpop.xlane.xlu0 %1099 }
 0x5fa   : > { %v1104_v2 = vmul.f32 %v1100_v36, %v2332_v12 }
 0x5fc   : > { %v1106_v37 = vsub.f32 %v2389_v30, %v1104_v2 }
 0x5fe   : > { %v1108_v38 = vmul.f32 %v1106_v37, %v1106_v37 }
 0x600   : > { %v1110_v39 = vsel %vm699_vm1, %v1108_v38, 0.0 }
 0x601   : > { %1111 = vadd.xlane.f32.xlu1 %v1110_v39  ;;  %v1103_v40 = vpop.xlane.xlu2 %1102 }
 0x602   : > { %v1105_v4 = vmul.f32 %v1103_v40, %v2332_v12 }
 0x604   : > { %v1107_v41 = vsub.f32 %v2394_v34, %v1105_v4 }
 0x606   : > { %v1109_v42 = vmul.f32 %v1107_v41, %v1107_v41 }
 0x608   : > { %v1113_v43 = vsel %vm699_vm1, %v1109_v42, 0.0 }
 0x609   : > { %1114 = vadd.xlane.f32.xlu0 %v1113_v43 }
 0x674   : > { %v1112_v45 = vpop.xlane.xlu1 %1111 }
 0x675   : > { %v1116_v46 = vmul.f32 %v1112_v45, %v2332_v12 }
 0x677   : > { %v1118_v48 = vadd.f32 1e-05, %v1116_v46 }
 0x679   : > { %1762 = vrsqrt.f32 %v1118_v48  ;;  %vm1126_vm15 = vweird.f32 %v1118_v48 }
 0x67c   : > { %v1115_v49 = vpop.xlane.xlu0 %1114 }
 0x67d   : > { %v1117_v50 = vmul.f32 %v1115_v49, %v2332_v12  ;;  %v1736_v12 = vld [vmem:[%s674_s26] ss:$0 sm:$0xff] }
 0x67f   : > { %v1763_v51 = vpop.eup %1762  ;;  %v1119_v52 = vadd.f32 1e-05, %v1117_v50 }
 0x680   : > { %v1121_v53 = vmul.f32 %v1763_v51, %v1118_v48  ;;  %vm1127_vm14 = vweird.f32 %v1763_v51 }
 0x681   : > { %1764 = vrsqrt.f32 %v1119_v52  ;;  %vm1128_vm0 = vmor %vm1126_vm15, %vm1127_vm14  ;;  %vm1136_vm3 = vweird.f32 %v1119_v52 }
 0x682   : > { %v1122_v54 = vmul.f32 %v1763_v51, %v1121_v53 }
 0x684   : > { %v1123_v55 = vmul.f32 0.5, %v1122_v54 }
 0x686   : > { %v1124_v56 = vsub.f32 1.5, %v1123_v55 }
 0x687   : > { %v1765_v57 = vpop.eup %1764 }
 0x688   : > { %v1125_v58 = vmul.f32 %v1763_v51, %v1124_v56  ;;  %v1131_v59 = vmul.f32 %v1765_v57, %v1119_v52  ;;  %vm1137_vm2 = vweird.f32 %v1765_v57 }
 0x689   : > { %vm1138_vm4 = vmor %vm1136_vm3, %vm1137_vm2 }
 0x68a   : > { %v1132_v60 = vmul.f32 %v1765_v57, %v1131_v59  ;;  %v1129_v61 = vsel %vm1128_vm0, %v1763_v51, %v1125_v58 }
 0x68b   : > { %v1140_v0 = vmul.f32 %v1129_v61, %v1106_v37 }
 0x68c   : > { %v1133_v62 = vmul.f32 0.5, %v1132_v60 }
 0x68d   : > { %v1146_v6 = vmul.f32 %v1736_v12, %v1140_v0 }
 0x68e   : > { %v1134_v63 = vsub.f32 1.5, %v1133_v62 }
 0x68f   : > { %v1152_v9 = vadd.f32 %v1737_v5, %v1146_v6 }
 0x690   : > { %v1135_v1 = vmul.f32 %v1765_v57, %v1134_v63 }
 0x692   : > { %v1139_v3 = vsel %vm1138_vm4, %v1765_v57, %v1135_v1 }
 0x693   : > { %v1141_v7 = vmul.f32 %v1139_v3, %v1107_v41  ;;  %v1739_v41 = vld [vmem:[%s685_s4] ss:$0 sm:$0xff]  ;;  %s2568_s4 = sand.u32 1, %s1984_s22  }
 0x694   : > { %s1272_s28 = scalar_lea.sflag [#allocation5], %s2568_s4 }
 0x695   : > { %v1147_v8 = vmul.f32 %v1736_v12, %v1141_v7 }
 0x697   : > { %v1153_v10 = vadd.f32 %v1737_v5, %v1147_v8 }
 0x699   : > { %v1154_v11 = vpack.c.bf16 %v1153_v10, %v1152_v9 }
 0x69b   : > { %1566 = vmatmul.msk.bf16.vlgmr.msra.gmra.mxu1 %vm699_vm1, %v1154_v11 }
 0x718   : > { %v1195_v18 = vpop.f32.mrf.mxu1 }
 0x719   : > { %v1196_v19 = vadd.f32 %v1738_v17, %v1195_v18 }
 0x71b   : > { %v1202_v20 = vmul.f32 0.044715, %v1196_v19  ;;  %v1200_v2 = vmul.f32 0.5, %v1196_v19 }
 0x71d   : > { %v1204_v21 = vmul.f32 %v1202_v20, %v1196_v19 }
 0x71f   : > { %v1206_v22 = vmul.f32 %v1204_v21, %v1196_v19 }
 0x720   : > { %v1197_v23 = vpop.f32.mrf.mxu1 }
 0x721   : > { %v1208_v24 = vadd.f32 %v1206_v22, %v1196_v19  ;;  %v1198_v25 = vadd.f32 %v1738_v17, %v1197_v23 }
 0x723   : > { %v1203_v26 = vmul.f32 0.044715, %v1198_v25  ;;  %v1210_v27 = vmul.f32 0.7978846, %v1208_v24  ;;  %v1201_v37 = vmul.f32 0.5, %v1198_v25 }
 0x725   : > { %v1205_v28 = vmul.f32 %v1203_v26, %v1198_v25  ;;  %1766 = vtanh.f32 %v1210_v27 }
 0x727   : > { %v1207_v29 = vmul.f32 %v1205_v28, %v1198_v25 }
 0x729   : > { %v1209_v31 = vadd.f32 %v1207_v29, %v1198_v25 }
 0x72b   : > { %v1211_v32 = vmul.f32 0.7978846, %v1209_v31  ;;  %v1767_v33 = vpop.eup %1766 }
 0x72c   : > { %v1214_v35 = vadd.f32 1.0, %v1767_v33 }
 0x72d   : > { %1768 = vtanh.f32 %v1211_v32 }
 0x72e   : > { %v1216_v39 = vmul.f32 %v1214_v35, %v1200_v2 }
 0x733   : > { %v1769_v36 = vpop.eup %1768 }
 0x734   : > { %v1215_v38 = vadd.f32 1.0, %v1769_v36 }
 0x736   : > { %v1217_v40 = vmul.f32 %v1215_v38, %v1201_v37 }
 0x738   : > { %v1218_v4 = vpack.c.bf16 %v1217_v40, %v1216_v39 }
 0x73a   : > { %1583 = vmatmul.msk.bf16.vlgmr.msra.gmra.mxu2 %vm1243_vm5, %v1218_v4 }
 0x7bd   : > { %v1256_v42 = vpop.f32.mrf.mxu2 }
 0x7be   : > { %v1261_v43 = vadd.f32 %v1256_v42, %v2389_v30 }
 0x7c0   : > { %v1267_v44 = vadd.f32 %v1739_v41, %v1261_v43 }
 0x7c2   : > { %1269 = vst.msk [vmem:[%s2317_s20] sm:$0xff] %vm699_vm1, %v1267_v44 }
 0x7c5   : > { %v1258_v45 = vpop.f32.mrf.mxu2 }
 0x7c6   : > { %v1262_v46 = vadd.f32 %v1258_v45, %v2394_v34 }
 0x7c8   : > { %v1268_v47 = vadd.f32 %v1739_v41, %v1262_v46 }
 0x7ca   : > { %1270 = vst.msk [vmem:[%s2317_s20 + $0x8] sm:$0xff] %vm699_vm1, %v1268_v47 }
 0x7cb   : > { %1917 = shalt.err (!%p1914_p5)
}
 0x7cc   : > { %s2031_s20 = smov 128   ;;  %s2032_s13 = smov 8  }
 0x7cd   : > { %1613 = dma.vmem_to_hbm [thread:$0]  (%p2190_p12), %s1285_s3, 256, %s1287_s7, %s1272_s28, %s2031_s20, %s2031_s20, %s2032_s13  }
 0x7ce PF: > { %s2569_s11 = sld [smem:[#allocation22_spill]] }
 0x7cf   : > { %s2570_s2 = sld [smem:[#allocation16_spill]] }
 0x7d4   : > { %p1633_p3 = scmp.ge.s32.totalorder %s2569_s11, 2 }
 0x7d5   : > { %s1301_s30 = sand.u32 1, %s2570_s2  }
 0x7d6   : > { %p1629_p6 = pnand %p1633_p3, %p2200_p2  ;;  %s1302_s26 = scalar_lea.sflag [#allocation5], %s1301_s30 }
 0x7d8   : > { %p1630_p7 = pneg %p1629_p6 }
 0x7da   : > { %1975 = dma.done.wait (%p1630_p7), %s1302_s26, 256  }
 0x7db   : > { %1977 = vsyncadd (%p1630_p7), %s1302_s26, 4294967040  ;;  %s34_s13 = sadd.s32 1, %s2569_s11   ;;  %s2572_s16 = sld [smem:[#allocation17_spill]] }
 0x7dc   : > { %p31_p9 = scmp.ge.s32.totalorder %s34_s13, 6   ;;  %s2573_s23 = sld [smem:[#allocation26_spill]] }
 0x7dd   : > { %s2574_s24 = sld [smem:[#allocation18_spill]]  ;;  %s2581_s21 = smov %s1984_s22 }
 0x7de   : > { %s2575_s25 = sld [smem:[#allocation19_spill]] }
 0x7df   : > { %s2576_s26 = sld [smem:[#allocation25_spill]]  ;;  %33 = sbr.rel (!%p31_p9) target bundleno = 26 (0x1a), region = 178 }
 0x7e0   : > { %s2577_s27 = sld [smem:[#allocation20_spill]] }
 0x7e1   : > { %s2578_s28 = sld [smem:[#allocation21_spill]]  ;;  %s2582_s22 = smov %s2572_s16 }
 0x7e2   : > { %s2579_s29 = sld [smem:[#allocation23_spill]] }
 0x7e3   : > { %s2580_s30 = sld [smem:[#allocation24_spill]] }
 0x7e4   :  { %1308 = vsyncpa [#allocation4], 1 }
 0x7e5   :  { %1310 = vsyncpa [#allocation4 + $0x1], 1 }
 0x7e6   :  { %1311 = vsyncpa [#allocation7], 1 }
 0x7e7   :  { %1313 = vsyncpa [#allocation7 + $0x1], 1 }
 0x7e8   :  { %1314 = vsyncpa [#allocation10], 1 }
 0x7e9   :  { %1316 = vsyncpa [#allocation10 + $0x1], 1 }
 0x7ea   :  { %1317 = vsyncpa [#allocation5], 1 }
 0x7eb   :  { %1319 = vsyncpa [#allocation5 + $0x1], 1 }

</bundles_post_ra>
